<compile_context>
chip_gen: v6e
topology: v6e:2x2x1
jax: 0.10.0
libtpu: 0.0.40
codegen_flags: <defaults>
</compile_context>

<pallas_src>
import functools

import jax
import jax.numpy as jnp
from jax.experimental import pallas as pl
from jax.experimental.pallas import tpu as pltpu


# ----------------------------------------------------------------------------
# Pallas kernels
# ----------------------------------------------------------------------------

def _bidir_lstm_kernel(x_ref, wih_ref, whh_ref, b_ref, out_ref,
                       h_scr, c_scr, gx_scr, *, tc, bsz, hdim, parts):
    """Fused bidirectional LSTM layer.

    Grid = (2, T // tc): axis 0 = direction (0=fwd, 1=bwd), axis 1 = time chunk.
    x_ref:   (parts, tc*bsz, Din)  bf16   -- chunk of the layer input
    wih_ref: (1, parts, Din, 4H)   bf16   -- this direction's input weights
    whh_ref: (1, H, 4H)            bf16
    b_ref:   (1, 1, 4H)            f32    -- b_ih + b_hh folded
    out_ref: (1, tc*bsz, H)        bf16
    (i/f/o gate columns of W and b are pre-scaled by 0.5 -- see wrapper.)
    """
    d = pl.program_id(0)
    t = pl.program_id(1)

    # Each direction restarts its recurrence at its own t == 0 (grid is
    # direction-major, so this also reinitializes when switching direction;
    # with megacore sharding each core owns one direction and its own scratch).
    @pl.when(t == 0)
    def _():
        h_scr[...] = jnp.zeros_like(h_scr)
        c_scr[...] = jnp.zeros_like(c_scr)

    # (1) Input projection for the whole chunk in one dense MXU pass per
    #     incoming direction-part: (tc*B, Din) @ (Din, 4H), f32 accumulate.
    acc = jnp.dot(x_ref[0], wih_ref[0, 0], preferred_element_type=jnp.float32)
    for p in range(1, parts):
        acc = acc + jnp.dot(x_ref[p], wih_ref[0, p],
                            preferred_element_type=jnp.float32)
    gx_scr[...] = acc + b_ref[0]            # bias folded in once per chunk

    whh = whh_ref[0]                        # (H, 4H) bf16, resident for the chunk

    def recurrence(time_order):
        h = h_scr[...]                      # (B, H) f32
        c = c_scr[...]                      # (B, H) f32
        for i in time_order:                # statically unrolled over the chunk
            r0 = i * bsz                    # static sublane offset
            g = gx_scr[r0:r0 + bsz, :] + jnp.dot(
                h.astype(jnp.bfloat16), whh,
                preferred_element_type=jnp.float32)          # (B, 4H) f32
            # i/f/o columns pre-scaled by 0.5, so ONE lane-dense tanh over the
            # whole (B, 4H) block gives tanh(x/2) for i,f,o and tanh(x) for g;
            # sigmoid(x) = 0.5*(tanh(x/2)+1).
            tg = jnp.tanh(g)
            i_g = 0.5 * (tg[:, 0 * hdim:1 * hdim] + 1.0)
            f_g = 0.5 * (tg[:, 1 * hdim:2 * hdim] + 1.0)
            g_g = tg[:, 2 * hdim:3 * hdim]
            o_g = 0.5 * (tg[:, 3 * hdim:4 * hdim] + 1.0)
            c = f_g * c + i_g * g_g
            h = o_g * jnp.tanh(c)
            # Store into the VMEM output block; the HBM writeback is one dense
            # DMA per chunk (handled by the out BlockSpec).
            out_ref[0, r0:r0 + bsz, :] = h.astype(out_ref.dtype)
        h_scr[...] = h
        c_scr[...] = c

    # Static step orders (no dynamic sublane offsets): forward walks 0..tc-1,
    # backward walks tc-1..0; chunk-level reversal lives in the index_map.
    @pl.when(d == 0)
    def _():
        recurrence(list(range(tc)))

    @pl.when(d == 1)
    def _():
        recurrence(list(range(tc - 1, -1, -1)))


def _proj_kernel(h_ref, w_ref, b_ref, o_ref):
    """Final projection: sum over the two direction parts, lane-dense output.

    h_ref: (2, rows, H) bf16; w_ref: (2, H, nout_pad) bf16;
    b_ref: (1, nout_pad) f32; o_ref: (rows, nout_pad) f32 (nout_pad % 128 == 0).
    """
    acc = jnp.dot(h_ref[0], w_ref[0], preferred_element_type=jnp.float32)
    acc = acc + jnp.dot(h_ref[1], w_ref[1], preferred_element_type=jnp.float32)
    o_ref[...] = acc + b_ref[...]


# ----------------------------------------------------------------------------
# Wrappers calling pallas_call
# ----------------------------------------------------------------------------

def _pick_time_chunk(T, B):
    """Largest convenient chunk so (tc*B) rows are a multiple of 8 and tc | T."""
    for tc in (32, 16, 8, 4, 2, 1):
        if T % tc == 0 and (tc * B) % 8 == 0:
            return tc
    return T


def bidir_lstm_layer(x_parts, w_ih, w_hh, bias, *, T, B, tc):
    """x_parts: (P, T*B, Din) bf16 -> (2, T*B, H) bf16 (dir-stacked hidden states)."""
    P, TB, Din = x_parts.shape
    H = w_hh.shape[1]
    n_chunks = T // tc
    rc = tc * B

    def tmap(d, t):
        # forward reads/writes chunk t; backward reads/writes chunk n_chunks-1-t.
        return t + d * (n_chunks - 1 - 2 * t)

    kernel = functools.partial(_bidir_lstm_kernel, tc=tc, bsz=B, hdim=H, parts=P)
    return pl.pallas_call(
        kernel,
        out_shape=jax.ShapeDtypeStruct((2, TB, H), jnp.bfloat16),
        grid_spec=pltpu.PrefetchScalarGridSpec(
            num_scalar_prefetch=0,
            grid=(2, n_chunks),
            in_specs=[
                pl.BlockSpec((P, rc, Din), lambda d, t: (0, tmap(d, t), 0)),
                pl.BlockSpec((1, P, Din, 4 * H), lambda d, t: (d, 0, 0, 0)),
                pl.BlockSpec((1, H, 4 * H), lambda d, t: (d, 0, 0)),
                pl.BlockSpec((1, 1, 4 * H), lambda d, t: (d, 0, 0)),
            ],
            out_specs=pl.BlockSpec((1, rc, H), lambda d, t: (d, tmap(d, t), 0)),
            scratch_shapes=[
                pltpu.VMEM((B, H), jnp.float32),        # h state (f32)
                pltpu.VMEM((B, H), jnp.float32),        # c state (f32)
                pltpu.VMEM((rc, 4 * H), jnp.float32),   # x@W_ih + b for the chunk
            ],
        ),
        compiler_params=pltpu.CompilerParams(
            # direction axis independent -> "parallel" (2 TCs on v7x);
            # time axis carries the recurrence -> "arbitrary" (sequential).
            dimension_semantics=("parallel", "arbitrary")),
    )(x_parts, w_ih, w_hh, bias)


def projection(h_parts, w, b, *, rows):
    """h_parts: (2, T*B, H) bf16; w: (2, H, nout_pad) bf16; b: (1, nout_pad) f32."""
    _, TB, H = h_parts.shape
    nout_pad = w.shape[-1]
    return pl.pallas_call(
        _proj_kernel,
        out_shape=jax.ShapeDtypeStruct((TB, nout_pad), jnp.float32),
        grid_spec=pltpu.PrefetchScalarGridSpec(
            num_scalar_prefetch=0,
            grid=(TB // rows,),
            in_specs=[
                pl.BlockSpec((2, rows, H), lambda i: (0, i, 0)),
                pl.BlockSpec((2, H, nout_pad), lambda i: (0, 0, 0)),
                pl.BlockSpec((1, nout_pad), lambda i: (0, 0)),
            ],
            out_specs=pl.BlockSpec((rows, nout_pad), lambda i: (i, 0)),
        ),
        compiler_params=pltpu.CompilerParams(
            dimension_semantics=("parallel",)),
    )(h_parts, w, b)


# ----------------------------------------------------------------------------
# Parameter construction (deterministic, mimics module __init__ shapes)
# ----------------------------------------------------------------------------

def init_raw_params(key, nin, nembed, nunits, nout, nlayers, padding_idx):
    """Raw f32 parameters in PyTorch-equivalent shapes (W stored transposed)."""
    keys = iter(jax.random.split(key, 1 + nlayers * 4 + 2))

    def u(k, shape, scale):
        return jax.random.uniform(k, shape, jnp.float32, -scale, scale)

    H = nunits
    params = {"nout": nout, "nunits": nunits}

    emb = u(next(keys), (nin, nembed), 1.0)
    params["embed"] = emb.at[padding_idx].set(0.0)   # nn.Embedding padding row = 0

    scale = 1.0 / float(nunits) ** 0.5
    lstm = []
    for layer in range(nlayers):
        P = 1 if layer == 0 else 2                   # incoming direction parts
        din = nembed if layer == 0 else nunits
        w_ih = u(next(keys), (2, P * din, 4 * H), scale)   # (dir, in, 4H), torch W^T
        w_hh = u(next(keys), (2, H, 4 * H), scale)
        b_ih = u(next(keys), (2, 4 * H), scale)
        b_hh = u(next(keys), (2, 4 * H), scale)
        lstm.append((
            w_ih.reshape(2, P, din, 4 * H),
            w_hh,
            (b_ih + b_hh).reshape(2, 1, 4 * H),      # bias folded (b_ih + b_hh)
        ))
    params["lstm"] = lstm

    pscale = 1.0 / float(2 * nunits) ** 0.5
    params["proj_w"] = u(next(keys), (2 * nunits, nout), pscale)
    params["proj_b"] = u(next(keys), (nout,), pscale)
    return params


def prepare_kernel_params(raw):
    """Kernel-side params: i/f/o gate columns pre-scaled by 0.5 (so the kernel
    can use a single full-width tanh per step), bf16 matmul weights, and a
    lane-dense padded projection."""
    H = raw["nunits"]
    nout = raw["nout"]
    # Gate order (i, f, g, o): scale i, f, o columns by 0.5; leave g unscaled.
    col_scale = (jnp.ones((4 * H,), jnp.float32)
                 .at[:2 * H].set(0.5)
                 .at[3 * H:].set(0.5))

    kp = {"nout": nout, "embed": raw["embed"]}
    lstm = []
    for (w_ih, w_hh, bias) in raw["lstm"]:
        lstm.append((
            (w_ih * col_scale).astype(jnp.bfloat16),     # (2, P, Din, 4H)
            (w_hh * col_scale).astype(jnp.bfloat16),     # (2, H, 4H)
            bias * col_scale,                            # (2, 1, 4H) f32
        ))
    kp["lstm"] = lstm

    nout_pad = ((nout + 127) // 128) * 128               # lane-dense projection output
    w_pad = jnp.zeros((2 * H, nout_pad), jnp.float32).at[:, :nout].set(raw["proj_w"])
    b_pad = jnp.zeros((1, nout_pad), jnp.float32).at[0, :nout].set(raw["proj_b"])
    kp["proj_w"] = w_pad.reshape(2, H, nout_pad).astype(jnp.bfloat16)
    kp["proj_b"] = b_pad
    return kp


# ----------------------------------------------------------------------------
# Full forward (lm=None path of StackedRNN, eval mode: dropout = identity)
# ----------------------------------------------------------------------------

def stacked_rnn_forward(kparams, x_tokens, *, tc=None):
    """x_tokens: int32 (B, T) -> (B, T, nout)."""
    B, T = x_tokens.shape
    if tc is None:
        tc = _pick_time_chunk(T, B)

    # Embedding lookup stays in JAX; transpose the tiny token matrix (not the
    # big activation tensor) so activations are produced time-major directly.
    # TODO(synk): nn.Embedding gather has no clean Pallas tile pattern here; it
    # is done with jnp.take in the wrapper.
    emb = jnp.take(kparams["embed"], x_tokens.T, axis=0)        # (T, B, E) f32
    x = emb.astype(jnp.bfloat16).reshape(1, T * B, -1)           # (P=1, T*B, E)

    for (w_ih, w_hh, bias) in kparams["lstm"]:
        x = bidir_lstm_layer(x, w_ih, w_hh, bias, T=T, B=B, tc=tc)   # (2, T*B, H)

    z = projection(x, kparams["proj_w"], kparams["proj_b"], rows=tc * B)
    z = z[:, :kparams["nout"]].reshape(T, B, -1)                # drop lane padding
    return jnp.transpose(z, (1, 0, 2))                          # (B, T, nout)


# ----------------------------------------------------------------------------
# Pure-JAX reference (raw unscaled params, same precision choices)
# ----------------------------------------------------------------------------

def _ref_bidir_layer(x_parts, w_ih, w_hh, bias):
    """x_parts: (P, T, B, Din) bf16 -> (2, T, B, H) bf16."""
    P, T, B, Din = x_parts.shape
    H = w_hh.shape[1]
    w_ih_b = w_ih.astype(jnp.bfloat16)
    w_hh_b = w_hh.astype(jnp.bfloat16)

    def run_dir(d):
        xs = x_parts if d == 0 else x_parts[:, ::-1]
        gx = jnp.zeros((T, B, 4 * H), jnp.float32)
        for p in range(P):
            gx = gx + jnp.einsum("tbd,dg->tbg", xs[p], w_ih_b[d, p],
                                 preferred_element_type=jnp.float32)
        gx = gx + bias[d]

        def step(carry, g_x):
            h, c = carry
            g = g_x + jnp.dot(h.astype(jnp.bfloat16), w_hh_b[d],
                              preferred_element_type=jnp.float32)
            i = jax.nn.sigmoid(g[:, 0 * H:1 * H])
            f = jax.nn.sigmoid(g[:, 1 * H:2 * H])
            gg = jnp.tanh(g[:, 2 * H:3 * H])
            o = jax.nn.sigmoid(g[:, 3 * H:4 * H])
            c = f * c + i * gg
            h = o * jnp.tanh(c)
            return (h, c), h

        init = (jnp.zeros((B, H), jnp.float32), jnp.zeros((B, H), jnp.float32))
        _, hs = jax.lax.scan(step, init, gx)                    # (T, B, H) f32
        return hs[::-1] if d == 1 else hs

    return jnp.stack([run_dir(0), run_dir(1)], 0).astype(jnp.bfloat16)


def stacked_rnn_reference(raw, x_tokens):
    B, T = x_tokens.shape
    H = raw["nunits"]
    emb = jnp.take(raw["embed"], x_tokens.T, axis=0)            # (T, B, E)
    x = emb.astype(jnp.bfloat16)[None]                          # (1, T, B, E)
    for (w_ih, w_hh, bias) in raw["lstm"]:
        x = _ref_bidir_layer(x, w_ih, w_hh, bias)               # (2, T, B, H)
    w_p = raw["proj_w"].reshape(2, H, raw["nout"]).astype(jnp.bfloat16)
    b_p = raw["proj_b"]
    z = (jnp.einsum("tbh,hn->tbn", x[0], w_p[0], preferred_element_type=jnp.float32)
         + jnp.einsum("tbh,hn->tbn", x[1], w_p[1], preferred_element_type=jnp.float32)
         + b_p)
    return jnp.transpose(z, (1, 0, 2))                          # (B, T, nout)


# ----------------------------------------------------------------------------
# Main
# ----------------------------------------------------------------------------

if __name__ == "__main__":
    # Small shapes consistent with the module's forward.
    # TODO(synk): PackedSequence and lm(LMEmbed) branches are not exercised / not
    # implemented; this covers the dense lm=None path.
    nin, nembed, nunits, nout, nlayers = 12, 32, 32, 16, 2
    padding_idx = nin - 1
    B, T = 2, 8

    key = jax.random.PRNGKey(0)
    k_params, k_tokens = jax.random.split(key)
    raw_params = init_raw_params(k_params, nin, nembed, nunits, nout, nlayers,
                                 padding_idx)
    kparams = prepare_kernel_params(raw_params)
    x_tokens = jax.random.randint(k_tokens, (B, T), 0, nin, dtype=jnp.int32)

    z = jax.block_until_ready(stacked_rnn_forward(kparams, x_tokens))
    z_ref = jax.block_until_ready(stacked_rnn_reference(raw_params, x_tokens))

    assert z.shape == (B, T, nout), z.shape
    err = float(jnp.max(jnp.abs(z - z_ref)))
    assert jnp.allclose(z, z_ref, rtol=1e-2, atol=1e-2), f"mismatch vs reference: {err}"

    print("KERNEL_OK")
</pallas_src>

<mosaic_0001>
module attributes {stable_mosaic.version = 11 : i64} {
  func.func @_bidir_lstm_kernel(%arg0: i32, %arg1: i32, %arg2: memref<1x16x32xbf16, #tpu.memory_space<vmem>>, %arg3: memref<1x1x32x128xbf16, #tpu.memory_space<vmem>>, %arg4: memref<1x32x128xbf16, #tpu.memory_space<vmem>>, %arg5: memref<1x1x128xf32, #tpu.memory_space<vmem>>, %arg6: memref<1x16x32xbf16, #tpu.memory_space<vmem>>, %arg7: memref<2x32xf32, #tpu.memory_space<vmem>>, %arg8: memref<2x32xf32, #tpu.memory_space<vmem>>, %arg9: memref<16x128xf32, #tpu.memory_space<vmem>>) attributes {dimension_semantics = [#tpu.dimension_semantics<parallel>, #tpu.dimension_semantics<arbitrary>], iteration_bounds = array<i64: 2, 1>, scalar_prefetch = 0 : i64, scratch_operands = 3 : i64, tpu.core_type = #tpu.core_type<tc>, window_params = [{transform_indices = @transform_0, window_bounds = array<i64: 1, 16, 32>}, {transform_indices = @transform_1, window_bounds = array<i64: 1, 1, 32, 128>}, {transform_indices = @transform_2, window_bounds = array<i64: 1, 32, 128>}, {transform_indices = @transform_3, window_bounds = array<i64: 1, 1, 128>}, {transform_indices = @transform_4, window_bounds = array<i64: 1, 16, 32>}]} {
    %c0_i32 = arith.constant 0 : i32
    %0 = arith.cmpi eq, %arg1, %c0_i32 : i32
    %1 = arith.extui %0 : i1 to i32
    %c0_i32_0 = arith.constant 0 : i32
    %2 = arith.cmpi ne, %1, %c0_i32_0 : i32
    scf.if %2 {
      %cst_18 = arith.constant 0.000000e+00 : f32
      %21 = vector.broadcast %cst_18 : f32 to vector<2x32xf32>
      %c0_19 = arith.constant 0 : index
      %c0_20 = arith.constant 0 : index
      %22 = vector.load %arg7[%c0_19, %c0_20] : memref<2x32xf32, #tpu.memory_space<vmem>>, vector<2x32xf32>
      tpu.vector_store %arg7[%c0_19, %c0_20], %21 {strides = array<i32>} : memref<2x32xf32, #tpu.memory_space<vmem>>, vector<2x32xf32>,
      %cst_21 = arith.constant 0.000000e+00 : f32
      %23 = vector.broadcast %cst_21 : f32 to vector<2x32xf32>
      %c0_22 = arith.constant 0 : index
      %c0_23 = arith.constant 0 : index
      %24 = vector.load %arg8[%c0_22, %c0_23] : memref<2x32xf32, #tpu.memory_space<vmem>>, vector<2x32xf32>
      tpu.vector_store %arg8[%c0_22, %c0_23], %23 {strides = array<i32>} : memref<2x32xf32, #tpu.memory_space<vmem>>, vector<2x32xf32>,
    } else {
    }
    %c0 = arith.constant 0 : index
    %c0_1 = arith.constant 0 : index
    %c0_2 = arith.constant 0 : index
    %3 = vector.load %arg2[%c0, %c0_1, %c0_2] : memref<1x16x32xbf16, #tpu.memory_space<vmem>>, vector<1x16x32xbf16>
    %4 = vector.shape_cast %3 : vector<1x16x32xbf16> to vector<16x32xbf16>
    %c0_3 = arith.constant 0 : index
    %c0_4 = arith.constant 0 : index
    %c0_5 = arith.constant 0 : index
    %c0_6 = arith.constant 0 : index
    %5 = vector.load %arg3[%c0_3, %c0_4, %c0_5, %c0_6] : memref<1x1x32x128xbf16, #tpu.memory_space<vmem>>, vector<1x1x32x128xbf16>
    %6 = vector.shape_cast %5 : vector<1x1x32x128xbf16> to vector<32x128xbf16>
    %cst = arith.constant dense<0.000000e+00> : vector<16x128xf32>
    %7 = tpu.matmul %4, %6, %cst {dimension_numbers = #tpu.dot_dimension_numbers<[1], [0], [0], [1], [0, 0, 1, 1], [], []>} : vector<16x32xbf16>, vector<32x128xbf16>, vector<16x128xf32> -> vector<16x128xf32>
    %c0_7 = arith.constant 0 : index
    %c0_8 = arith.constant 0 : index
    %c0_9 = arith.constant 0 : index
    %8 = vector.load %arg5[%c0_7, %c0_8, %c0_9] : memref<1x1x128xf32, #tpu.memory_space<vmem>>, vector<1x1x128xf32>
    %9 = vector.shape_cast %8 : vector<1x1x128xf32> to vector<1x128xf32>
    %10 = vector.broadcast %9 : vector<1x128xf32> to vector<16x128xf32>
    %11 = arith.addf %7, %10 : vector<16x128xf32>
    %c0_10 = arith.constant 0 : index
    %c0_11 = arith.constant 0 : index
    %12 = vector.load %arg9[%c0_10, %c0_11] : memref<16x128xf32, #tpu.memory_space<vmem>>, vector<16x128xf32>
    tpu.vector_store %arg9[%c0_10, %c0_11], %11 {strides = array<i32>} : memref<16x128xf32, #tpu.memory_space<vmem>>, vector<16x128xf32>,
    %c0_12 = arith.constant 0 : index
    %c0_13 = arith.constant 0 : index
    %c0_14 = arith.constant 0 : index
    %13 = vector.load %arg4[%c0_12, %c0_13, %c0_14] : memref<1x32x128xbf16, #tpu.memory_space<vmem>>, vector<1x32x128xbf16>
    %14 = vector.shape_cast %13 : vector<1x32x128xbf16> to vector<32x128xbf16>
    %c0_i32_15 = arith.constant 0 : i32
    %15 = arith.cmpi eq, %arg0, %c0_i32_15 : i32
    %16 = arith.extui %15 : i1 to i32
    %c0_i32_16 = arith.constant 0 : i32
    %17 = arith.cmpi ne, %16, %c0_i32_16 : i32
    scf.if %17 {
      %c0_18 = arith.constant 0 : index
      %c0_19 = arith.constant 0 : index
      %21 = vector.load %arg7[%c0_18, %c0_19] : memref<2x32xf32, #tpu.memory_space<vmem>>, vector<2x32xf32>
      %c0_20 = arith.constant 0 : index
      %c0_21 = arith.constant 0 : index
      %22 = vector.load %arg8[%c0_20, %c0_21] : memref<2x32xf32, #tpu.memory_space<vmem>>, vector<2x32xf32>
      %c0_22 = arith.constant 0 : index
      %c0_23 = arith.constant 0 : index
      %23 = vector.load %arg9[%c0_22, %c0_23] : memref<16x128xf32, #tpu.memory_space<vmem>>, vector<2x128xf32>
      %24 = arith.truncf %21 : vector<2x32xf32> to vector<2x32xbf16>
      %cst_24 = arith.constant dense<0.000000e+00> : vector<2x128xf32>
      %25 = tpu.matmul %24, %14, %cst_24 {dimension_numbers = #tpu.dot_dimension_numbers<[1], [0], [0], [1], [0, 0, 1, 1], [], []>} : vector<2x32xbf16>, vector<32x128xbf16>, vector<2x128xf32> -> vector<2x128xf32>
      %26 = arith.addf %23, %25 : vector<2x128xf32>
      %27 = math.tanh %26 : vector<2x128xf32>
      %28 = vector.extract_strided_slice %27 {offsets = [0, 0], sizes = [2, 32], strides = [1, 1]} : vector<2x128xf32> to vector<2x32xf32>
      %cst_25 = arith.constant 1.000000e+00 : f32
      %29 = vector.broadcast %cst_25 : f32 to vector<2x32xf32>
      %30 = arith.addf %28, %29 : vector<2x32xf32>
      %cst_26 = arith.constant 5.000000e-01 : f32
      %31 = vector.broadcast %cst_26 : f32 to vector<2x32xf32>
      %32 = arith.mulf %31, %30 : vector<2x32xf32>
      %33 = vector.extract_strided_slice %27 {offsets = [0, 32], sizes = [2, 32], strides = [1, 1]} : vector<2x128xf32> to vector<2x32xf32>
      %cst_27 = arith.constant 1.000000e+00 : f32
      %34 = vector.broadcast %cst_27 : f32 to vector<2x32xf32>
      %35 = arith.addf %33, %34 : vector<2x32xf32>
      %cst_28 = arith.constant 5.000000e-01 : f32
      %36 = vector.broadcast %cst_28 : f32 to vector<2x32xf32>
      %37 = arith.mulf %36, %35 : vector<2x32xf32>
      %38 = vector.extract_strided_slice %27 {offsets = [0, 64], sizes = [2, 32], strides = [1, 1]} : vector<2x128xf32> to vector<2x32xf32>
      %39 = vector.extract_strided_slice %27 {offsets = [0, 96], sizes = [2, 32], strides = [1, 1]} : vector<2x128xf32> to vector<2x32xf32>
      %cst_29 = arith.constant 1.000000e+00 : f32
      %40 = vector.broadcast %cst_29 : f32 to vector<2x32xf32>
      %41 = arith.addf %39, %40 : vector<2x32xf32>
      %cst_30 = arith.constant 5.000000e-01 : f32
      %42 = vector.broadcast %cst_30 : f32 to vector<2x32xf32>
      %43 = arith.mulf %42, %41 : vector<2x32xf32>
      %44 = arith.mulf %37, %22 : vector<2x32xf32>
      %45 = arith.mulf %32, %38 : vector<2x32xf32>
      %46 = arith.addf %44, %45 : vector<2x32xf32>
      %47 = math.tanh %46 : vector<2x32xf32>
      %48 = arith.mulf %43, %47 : vector<2x32xf32>
      %49 = arith.truncf %48 : vector<2x32xf32> to vector<2x32xbf16>
      %c0_31 = arith.constant 0 : index
      %c0_32 = arith.constant 0 : index
      %c0_33 = arith.constant 0 : index
      %50 = vector.load %arg6[%c0_31, %c0_32, %c0_33] : memref<1x16x32xbf16, #tpu.memory_space<vmem>>, vector<1x2x32xbf16>
      %51 = vector.shape_cast %50 : vector<1x2x32xbf16> to vector<2x32xbf16>
      %52 = vector.shape_cast %49 : vector<2x32xbf16> to vector<1x2x32xbf16>
      tpu.vector_store %arg6[%c0_31, %c0_32, %c0_33], %52 {strides = array<i32>} : memref<1x16x32xbf16, #tpu.memory_space<vmem>>, vector<1x2x32xbf16>,
      %c2 = arith.constant 2 : index
      %c0_34 = arith.constant 0 : index
      %53 = vector.load %arg9[%c2, %c0_34] : memref<16x128xf32, #tpu.memory_space<vmem>>, vector<2x128xf32>
      %54 = arith.truncf %48 : vector<2x32xf32> to vector<2x32xbf16>
      %cst_35 = arith.constant dense<0.000000e+00> : vector<2x128xf32>
      %55 = tpu.matmul %54, %14, %cst_35 {dimension_numbers = #tpu.dot_dimension_numbers<[1], [0], [0], [1], [0, 0, 1, 1], [], []>} : vector<2x32xbf16>, vector<32x128xbf16>, vector<2x128xf32> -> vector<2x128xf32>
      %56 = arith.addf %53, %55 : vector<2x128xf32>
      %57 = math.tanh %56 : vector<2x128xf32>
      %58 = vector.extract_strided_slice %57 {offsets = [0, 0], sizes = [2, 32], strides = [1, 1]} : vector<2x128xf32> to vector<2x32xf32>
      %cst_36 = arith.constant 1.000000e+00 : f32
      %59 = vector.broadcast %cst_36 : f32 to vector<2x32xf32>
      %60 = arith.addf %58, %59 : vector<2x32xf32>
      %cst_37 = arith.constant 5.000000e-01 : f32
      %61 = vector.broadcast %cst_37 : f32 to vector<2x32xf32>
      %62 = arith.mulf %61, %60 : vector<2x32xf32>
      %63 = vector.extract_strided_slice %57 {offsets = [0, 32], sizes = [2, 32], strides = [1, 1]} : vector<2x128xf32> to vector<2x32xf32>
      %cst_38 = arith.constant 1.000000e+00 : f32
      %64 = vector.broadcast %cst_38 : f32 to vector<2x32xf32>
      %65 = arith.addf %63, %64 : vector<2x32xf32>
      %cst_39 = arith.constant 5.000000e-01 : f32
      %66 = vector.broadcast %cst_39 : f32 to vector<2x32xf32>
      %67 = arith.mulf %66, %65 : vector<2x32xf32>
      %68 = vector.extract_strided_slice %57 {offsets = [0, 64], sizes = [2, 32], strides = [1, 1]} : vector<2x128xf32> to vector<2x32xf32>
      %69 = vector.extract_strided_slice %57 {offsets = [0, 96], sizes = [2, 32], strides = [1, 1]} : vector<2x128xf32> to vector<2x32xf32>
      %cst_40 = arith.constant 1.000000e+00 : f32
      %70 = vector.broadcast %cst_40 : f32 to vector<2x32xf32>
      %71 = arith.addf %69, %70 : vector<2x32xf32>
      %cst_41 = arith.constant 5.000000e-01 : f32
      %72 = vector.broadcast %cst_41 : f32 to vector<2x32xf32>
      %73 = arith.mulf %72, %71 : vector<2x32xf32>
      %74 = arith.mulf %67, %46 : vector<2x32xf32>
      %75 = arith.mulf %62, %68 : vector<2x32xf32>
      %76 = arith.addf %74, %75 : vector<2x32xf32>
      %77 = math.tanh %76 : vector<2x32xf32>
      %78 = arith.mulf %73, %77 : vector<2x32xf32>
      %79 = arith.truncf %78 : vector<2x32xf32> to vector<2x32xbf16>
      %c0_42 = arith.constant 0 : index
      %c2_43 = arith.constant 2 : index
      %c0_44 = arith.constant 0 : index
      %80 = vector.load %arg6[%c0_42, %c2_43, %c0_44] : memref<1x16x32xbf16, #tpu.memory_space<vmem>>, vector<1x2x32xbf16>
      %81 = vector.shape_cast %80 : vector<1x2x32xbf16> to vector<2x32xbf16>
      %82 = vector.shape_cast %79 : vector<2x32xbf16> to vector<1x2x32xbf16>
      tpu.vector_store %arg6[%c0_42, %c2_43, %c0_44], %82 {strides = array<i32>} : memref<1x16x32xbf16, #tpu.memory_space<vmem>>, vector<1x2x32xbf16>,
      %c4 = arith.constant 4 : index
      %c0_45 = arith.constant 0 : index
      %83 = vector.load %arg9[%c4, %c0_45] : memref<16x128xf32, #tpu.memory_space<vmem>>, vector<2x128xf32>
      %84 = arith.truncf %78 : vector<2x32xf32> to vector<2x32xbf16>
      %cst_46 = arith.constant dense<0.000000e+00> : vector<2x128xf32>
      %85 = tpu.matmul %84, %14, %cst_46 {dimension_numbers = #tpu.dot_dimension_numbers<[1], [0], [0], [1], [0, 0, 1, 1], [], []>} : vector<2x32xbf16>, vector<32x128xbf16>, vector<2x128xf32> -> vector<2x128xf32>
      %86 = arith.addf %83, %85 : vector<2x128xf32>
      %87 = math.tanh %86 : vector<2x128xf32>
      %88 = vector.extract_strided_slice %87 {offsets = [0, 0], sizes = [2, 32], strides = [1, 1]} : vector<2x128xf32> to vector<2x32xf32>
      %cst_47 = arith.constant 1.000000e+00 : f32
      %89 = vector.broadcast %cst_47 : f32 to vector<2x32xf32>
      %90 = arith.addf %88, %89 : vector<2x32xf32>
      %cst_48 = arith.constant 5.000000e-01 : f32
      %91 = vector.broadcast %cst_48 : f32 to vector<2x32xf32>
      %92 = arith.mulf %91, %90 : vector<2x32xf32>
      %93 = vector.extract_strided_slice %87 {offsets = [0, 32], sizes = [2, 32], strides = [1, 1]} : vector<2x128xf32> to vector<2x32xf32>
      %cst_49 = arith.constant 1.000000e+00 : f32
      %94 = vector.broadcast %cst_49 : f32 to vector<2x32xf32>
      %95 = arith.addf %93, %94 : vector<2x32xf32>
      %cst_50 = arith.constant 5.000000e-01 : f32
      %96 = vector.broadcast %cst_50 : f32 to vector<2x32xf32>
      %97 = arith.mulf %96, %95 : vector<2x32xf32>
      %98 = vector.extract_strided_slice %87 {offsets = [0, 64], sizes = [2, 32], strides = [1, 1]} : vector<2x128xf32> to vector<2x32xf32>
      %99 = vector.extract_strided_slice %87 {offsets = [0, 96], sizes = [2, 32], strides = [1, 1]} : vector<2x128xf32> to vector<2x32xf32>
      %cst_51 = arith.constant 1.000000e+00 : f32
      %100 = vector.broadcast %cst_51 : f32 to vector<2x32xf32>
      %101 = arith.addf %99, %100 : vector<2x32xf32>
      %cst_52 = arith.constant 5.000000e-01 : f32
      %102 = vector.broadcast %cst_52 : f32 to vector<2x32xf32>
      %103 = arith.mulf %102, %101 : vector<2x32xf32>
      %104 = arith.mulf %97, %76 : vector<2x32xf32>
      %105 = arith.mulf %92, %98 : vector<2x32xf32>
      %106 = arith.addf %104, %105 : vector<2x32xf32>
      %107 = math.tanh %106 : vector<2x32xf32>
      %108 = arith.mulf %103, %107 : vector<2x32xf32>
      %109 = arith.truncf %108 : vector<2x32xf32> to vector<2x32xbf16>
      %c0_53 = arith.constant 0 : index
      %c4_54 = arith.constant 4 : index
      %c0_55 = arith.constant 0 : index
      %110 = vector.load %arg6[%c0_53, %c4_54, %c0_55] : memref<1x16x32xbf16, #tpu.memory_space<vmem>>, vector<1x2x32xbf16>
      %111 = vector.shape_cast %110 : vector<1x2x32xbf16> to vector<2x32xbf16>
      %112 = vector.shape_cast %109 : vector<2x32xbf16> to vector<1x2x32xbf16>
      tpu.vector_store %arg6[%c0_53, %c4_54, %c0_55], %112 {strides = array<i32>} : memref<1x16x32xbf16, #tpu.memory_space<vmem>>, vector<1x2x32xbf16>,
      %c6 = arith.constant 6 : index
      %c0_56 = arith.constant 0 : index
      %113 = vector.load %arg9[%c6, %c0_56] : memref<16x128xf32, #tpu.memory_space<vmem>>, vector<2x128xf32>
      %114 = arith.truncf %108 : vector<2x32xf32> to vector<2x32xbf16>
      %cst_57 = arith.constant dense<0.000000e+00> : vector<2x128xf32>
      %115 = tpu.matmul %114, %14, %cst_57 {dimension_numbers = #tpu.dot_dimension_numbers<[1], [0], [0], [1], [0, 0, 1, 1], [], []>} : vector<2x32xbf16>, vector<32x128xbf16>, vector<2x128xf32> -> vector<2x128xf32>
      %116 = arith.addf %113, %115 : vector<2x128xf32>
      %117 = math.tanh %116 : vector<2x128xf32>
      %118 = vector.extract_strided_slice %117 {offsets = [0, 0], sizes = [2, 32], strides = [1, 1]} : vector<2x128xf32> to vector<2x32xf32>
      %cst_58 = arith.constant 1.000000e+00 : f32
      %119 = vector.broadcast %cst_58 : f32 to vector<2x32xf32>
      %120 = arith.addf %118, %119 : vector<2x32xf32>
      %cst_59 = arith.constant 5.000000e-01 : f32
      %121 = vector.broadcast %cst_59 : f32 to vector<2x32xf32>
      %122 = arith.mulf %121, %120 : vector<2x32xf32>
      %123 = vector.extract_strided_slice %117 {offsets = [0, 32], sizes = [2, 32], strides = [1, 1]} : vector<2x128xf32> to vector<2x32xf32>
      %cst_60 = arith.constant 1.000000e+00 : f32
      %124 = vector.broadcast %cst_60 : f32 to vector<2x32xf32>
      %125 = arith.addf %123, %124 : vector<2x32xf32>
      %cst_61 = arith.constant 5.000000e-01 : f32
      %126 = vector.broadcast %cst_61 : f32 to vector<2x32xf32>
      %127 = arith.mulf %126, %125 : vector<2x32xf32>
      %128 = vector.extract_strided_slice %117 {offsets = [0, 64], sizes = [2, 32], strides = [1, 1]} : vector<2x128xf32> to vector<2x32xf32>
      %129 = vector.extract_strided_slice %117 {offsets = [0, 96], sizes = [2, 32], strides = [1, 1]} : vector<2x128xf32> to vector<2x32xf32>
      %cst_62 = arith.constant 1.000000e+00 : f32
      %130 = vector.broadcast %cst_62 : f32 to vector<2x32xf32>
      %131 = arith.addf %129, %130 : vector<2x32xf32>
      %cst_63 = arith.constant 5.000000e-01 : f32
      %132 = vector.broadcast %cst_63 : f32 to vector<2x32xf32>
      %133 = arith.mulf %132, %131 : vector<2x32xf32>
      %134 = arith.mulf %127, %106 : vector<2x32xf32>
      %135 = arith.mulf %122, %128 : vector<2x32xf32>
      %136 = arith.addf %134, %135 : vector<2x32xf32>
      %137 = math.tanh %136 : vector<2x32xf32>
      %138 = arith.mulf %133, %137 : vector<2x32xf32>
      %139 = arith.truncf %138 : vector<2x32xf32> to vector<2x32xbf16>
      %c0_64 = arith.constant 0 : index
      %c6_65 = arith.constant 6 : index
      %c0_66 = arith.constant 0 : index
      %140 = vector.load %arg6[%c0_64, %c6_65, %c0_66] : memref<1x16x32xbf16, #tpu.memory_space<vmem>>, vector<1x2x32xbf16>
      %141 = vector.shape_cast %140 : vector<1x2x32xbf16> to vector<2x32xbf16>
      %142 = vector.shape_cast %139 : vector<2x32xbf16> to vector<1x2x32xbf16>
      tpu.vector_store %arg6[%c0_64, %c6_65, %c0_66], %142 {strides = array<i32>} : memref<1x16x32xbf16, #tpu.memory_space<vmem>>, vector<1x2x32xbf16>,
      %c8 = arith.constant 8 : index
      %c0_67 = arith.constant 0 : index
      %143 = vector.load %arg9[%c8, %c0_67] : memref<16x128xf32, #tpu.memory_space<vmem>>, vector<2x128xf32>
      %144 = arith.truncf %138 : vector<2x32xf32> to vector<2x32xbf16>
      %cst_68 = arith.constant dense<0.000000e+00> : vector<2x128xf32>
      %145 = tpu.matmul %144, %14, %cst_68 {dimension_numbers = #tpu.dot_dimension_numbers<[1], [0], [0], [1], [0, 0, 1, 1], [], []>} : vector<2x32xbf16>, vector<32x128xbf16>, vector<2x128xf32> -> vector<2x128xf32>
      %146 = arith.addf %143, %145 : vector<2x128xf32>
      %147 = math.tanh %146 : vector<2x128xf32>
      %148 = vector.extract_strided_slice %147 {offsets = [0, 0], sizes = [2, 32], strides = [1, 1]} : vector<2x128xf32> to vector<2x32xf32>
      %cst_69 = arith.constant 1.000000e+00 : f32
      %149 = vector.broadcast %cst_69 : f32 to vector<2x32xf32>
      %150 = arith.addf %148, %149 : vector<2x32xf32>
      %cst_70 = arith.constant 5.000000e-01 : f32
      %151 = vector.broadcast %cst_70 : f32 to vector<2x32xf32>
      %152 = arith.mulf %151, %150 : vector<2x32xf32>
      %153 = vector.extract_strided_slice %147 {offsets = [0, 32], sizes = [2, 32], strides = [1, 1]} : vector<2x128xf32> to vector<2x32xf32>
      %cst_71 = arith.constant 1.000000e+00 : f32
      %154 = vector.broadcast %cst_71 : f32 to vector<2x32xf32>
      %155 = arith.addf %153, %154 : vector<2x32xf32>
      %cst_72 = arith.constant 5.000000e-01 : f32
      %156 = vector.broadcast %cst_72 : f32 to vector<2x32xf32>
      %157 = arith.mulf %156, %155 : vector<2x32xf32>
      %158 = vector.extract_strided_slice %147 {offsets = [0, 64], sizes = [2, 32], strides = [1, 1]} : vector<2x128xf32> to vector<2x32xf32>
      %159 = vector.extract_strided_slice %147 {offsets = [0, 96], sizes = [2, 32], strides = [1, 1]} : vector<2x128xf32> to vector<2x32xf32>
      %cst_73 = arith.constant 1.000000e+00 : f32
      %160 = vector.broadcast %cst_73 : f32 to vector<2x32xf32>
      %161 = arith.addf %159, %160 : vector<2x32xf32>
      %cst_74 = arith.constant 5.000000e-01 : f32
      %162 = vector.broadcast %cst_74 : f32 to vector<2x32xf32>
      %163 = arith.mulf %162, %161 : vector<2x32xf32>
      %164 = arith.mulf %157, %136 : vector<2x32xf32>
      %165 = arith.mulf %152, %158 : vector<2x32xf32>
      %166 = arith.addf %164, %165 : vector<2x32xf32>
      %167 = math.tanh %166 : vector<2x32xf32>
      %168 = arith.mulf %163, %167 : vector<2x32xf32>
      %169 = arith.truncf %168 : vector<2x32xf32> to vector<2x32xbf16>
      %c0_75 = arith.constant 0 : index
      %c8_76 = arith.constant 8 : index
      %c0_77 = arith.constant 0 : index
      %170 = vector.load %arg6[%c0_75, %c8_76, %c0_77] : memref<1x16x32xbf16, #tpu.memory_space<vmem>>, vector<1x2x32xbf16>
      %171 = vector.shape_cast %170 : vector<1x2x32xbf16> to vector<2x32xbf16>
      %172 = vector.shape_cast %169 : vector<2x32xbf16> to vector<1x2x32xbf16>
      tpu.vector_store %arg6[%c0_75, %c8_76, %c0_77], %172 {strides = array<i32>} : memref<1x16x32xbf16, #tpu.memory_space<vmem>>, vector<1x2x32xbf16>,
      %c10 = arith.constant 10 : index
      %c0_78 = arith.constant 0 : index
      %173 = vector.load %arg9[%c10, %c0_78] : memref<16x128xf32, #tpu.memory_space<vmem>>, vector<2x128xf32>
      %174 = arith.truncf %168 : vector<2x32xf32> to vector<2x32xbf16>
      %cst_79 = arith.constant dense<0.000000e+00> : vector<2x128xf32>
      %175 = tpu.matmul %174, %14, %cst_79 {dimension_numbers = #tpu.dot_dimension_numbers<[1], [0], [0], [1], [0, 0, 1, 1], [], []>} : vector<2x32xbf16>, vector<32x128xbf16>, vector<2x128xf32> -> vector<2x128xf32>
      %176 = arith.addf %173, %175 : vector<2x128xf32>
      %177 = math.tanh %176 : vector<2x128xf32>
      %178 = vector.extract_strided_slice %177 {offsets = [0, 0], sizes = [2, 32], strides = [1, 1]} : vector<2x128xf32> to vector<2x32xf32>
      %cst_80 = arith.constant 1.000000e+00 : f32
      %179 = vector.broadcast %cst_80 : f32 to vector<2x32xf32>
      %180 = arith.addf %178, %179 : vector<2x32xf32>
      %cst_81 = arith.constant 5.000000e-01 : f32
      %181 = vector.broadcast %cst_81 : f32 to vector<2x32xf32>
      %182 = arith.mulf %181, %180 : vector<2x32xf32>
      %183 = vector.extract_strided_slice %177 {offsets = [0, 32], sizes = [2, 32], strides = [1, 1]} : vector<2x128xf32> to vector<2x32xf32>
      %cst_82 = arith.constant 1.000000e+00 : f32
      %184 = vector.broadcast %cst_82 : f32 to vector<2x32xf32>
      %185 = arith.addf %183, %184 : vector<2x32xf32>
      %cst_83 = arith.constant 5.000000e-01 : f32
      %186 = vector.broadcast %cst_83 : f32 to vector<2x32xf32>
      %187 = arith.mulf %186, %185 : vector<2x32xf32>
      %188 = vector.extract_strided_slice %177 {offsets = [0, 64], sizes = [2, 32], strides = [1, 1]} : vector<2x128xf32> to vector<2x32xf32>
      %189 = vector.extract_strided_slice %177 {offsets = [0, 96], sizes = [2, 32], strides = [1, 1]} : vector<2x128xf32> to vector<2x32xf32>
      %cst_84 = arith.constant 1.000000e+00 : f32
      %190 = vector.broadcast %cst_84 : f32 to vector<2x32xf32>
      %191 = arith.addf %189, %190 : vector<2x32xf32>
      %cst_85 = arith.constant 5.000000e-01 : f32
      %192 = vector.broadcast %cst_85 : f32 to vector<2x32xf32>
      %193 = arith.mulf %192, %191 : vector<2x32xf32>
      %194 = arith.mulf %187, %166 : vector<2x32xf32>
      %195 = arith.mulf %182, %188 : vector<2x32xf32>
      %196 = arith.addf %194, %195 : vector<2x32xf32>
      %197 = math.tanh %196 : vector<2x32xf32>
      %198 = arith.mulf %193, %197 : vector<2x32xf32>
      %199 = arith.truncf %198 : vector<2x32xf32> to vector<2x32xbf16>
      %c0_86 = arith.constant 0 : index
      %c10_87 = arith.constant 10 : index
      %c0_88 = arith.constant 0 : index
      %200 = vector.load %arg6[%c0_86, %c10_87, %c0_88] : memref<1x16x32xbf16, #tpu.memory_space<vmem>>, vector<1x2x32xbf16>
      %201 = vector.shape_cast %200 : vector<1x2x32xbf16> to vector<2x32xbf16>
      %202 = vector.shape_cast %199 : vector<2x32xbf16> to vector<1x2x32xbf16>
      tpu.vector_store %arg6[%c0_86, %c10_87, %c0_88], %202 {strides = array<i32>} : memref<1x16x32xbf16, #tpu.memory_space<vmem>>, vector<1x2x32xbf16>,
      %c12 = arith.constant 12 : index
      %c0_89 = arith.constant 0 : index
      %203 = vector.load %arg9[%c12, %c0_89] : memref<16x128xf32, #tpu.memory_space<vmem>>, vector<2x128xf32>
      %204 = arith.truncf %198 : vector<2x32xf32> to vector<2x32xbf16>
      %cst_90 = arith.constant dense<0.000000e+00> : vector<2x128xf32>
      %205 = tpu.matmul %204, %14, %cst_90 {dimension_numbers = #tpu.dot_dimension_numbers<[1], [0], [0], [1], [0, 0, 1, 1], [], []>} : vector<2x32xbf16>, vector<32x128xbf16>, vector<2x128xf32> -> vector<2x128xf32>
      %206 = arith.addf %203, %205 : vector<2x128xf32>
      %207 = math.tanh %206 : vector<2x128xf32>
      %208 = vector.extract_strided_slice %207 {offsets = [0, 0], sizes = [2, 32], strides = [1, 1]} : vector<2x128xf32> to vector<2x32xf32>
      %cst_91 = arith.constant 1.000000e+00 : f32
      %209 = vector.broadcast %cst_91 : f32 to vector<2x32xf32>
      %210 = arith.addf %208, %209 : vector<2x32xf32>
      %cst_92 = arith.constant 5.000000e-01 : f32
      %211 = vector.broadcast %cst_92 : f32 to vector<2x32xf32>
      %212 = arith.mulf %211, %210 : vector<2x32xf32>
      %213 = vector.extract_strided_slice %207 {offsets = [0, 32], sizes = [2, 32], strides = [1, 1]} : vector<2x128xf32> to vector<2x32xf32>
      %cst_93 = arith.constant 1.000000e+00 : f32
      %214 = vector.broadcast %cst_93 : f32 to vector<2x32xf32>
      %215 = arith.addf %213, %214 : vector<2x32xf32>
      %cst_94 = arith.constant 5.000000e-01 : f32
      %216 = vector.broadcast %cst_94 : f32 to vector<2x32xf32>
      %217 = arith.mulf %216, %215 : vector<2x32xf32>
      %218 = vector.extract_strided_slice %207 {offsets = [0, 64], sizes = [2, 32], strides = [1, 1]} : vector<2x128xf32> to vector<2x32xf32>
      %219 = vector.extract_strided_slice %207 {offsets = [0, 96], sizes = [2, 32], strides = [1, 1]} : vector<2x128xf32> to vector<2x32xf32>
      %cst_95 = arith.constant 1.000000e+00 : f32
      %220 = vector.broadcast %cst_95 : f32 to vector<2x32xf32>
      %221 = arith.addf %219, %220 : vector<2x32xf32>
      %cst_96 = arith.constant 5.000000e-01 : f32
      %222 = vector.broadcast %cst_96 : f32 to vector<2x32xf32>
      %223 = arith.mulf %222, %221 : vector<2x32xf32>
      %224 = arith.mulf %217, %196 : vector<2x32xf32>
      %225 = arith.mulf %212, %218 : vector<2x32xf32>
      %226 = arith.addf %224, %225 : vector<2x32xf32>
      %227 = math.tanh %226 : vector<2x32xf32>
      %228 = arith.mulf %223, %227 : vector<2x32xf32>
      %229 = arith.truncf %228 : vector<2x32xf32> to vector<2x32xbf16>
      %c0_97 = arith.constant 0 : index
      %c12_98 = arith.constant 12 : index
      %c0_99 = arith.constant 0 : index
      %230 = vector.load %arg6[%c0_97, %c12_98, %c0_99] : memref<1x16x32xbf16, #tpu.memory_space<vmem>>, vector<1x2x32xbf16>
      %231 = vector.shape_cast %230 : vector<1x2x32xbf16> to vector<2x32xbf16>
      %232 = vector.shape_cast %229 : vector<2x32xbf16> to vector<1x2x32xbf16>
      tpu.vector_store %arg6[%c0_97, %c12_98, %c0_99], %232 {strides = array<i32>} : memref<1x16x32xbf16, #tpu.memory_space<vmem>>, vector<1x2x32xbf16>,
      %c14 = arith.constant 14 : index
      %c0_100 = arith.constant 0 : index
      %233 = vector.load %arg9[%c14, %c0_100] : memref<16x128xf32, #tpu.memory_space<vmem>>, vector<2x128xf32>
      %234 = arith.truncf %228 : vector<2x32xf32> to vector<2x32xbf16>
      %cst_101 = arith.constant dense<0.000000e+00> : vector<2x128xf32>
      %235 = tpu.matmul %234, %14, %cst_101 {dimension_numbers = #tpu.dot_dimension_numbers<[1], [0], [0], [1], [0, 0, 1, 1], [], []>} : vector<2x32xbf16>, vector<32x128xbf16>, vector<2x128xf32> -> vector<2x128xf32>
      %236 = arith.addf %233, %235 : vector<2x128xf32>
      %237 = math.tanh %236 : vector<2x128xf32>
      %238 = vector.extract_strided_slice %237 {offsets = [0, 0], sizes = [2, 32], strides = [1, 1]} : vector<2x128xf32> to vector<2x32xf32>
      %cst_102 = arith.constant 1.000000e+00 : f32
      %239 = vector.broadcast %cst_102 : f32 to vector<2x32xf32>
      %240 = arith.addf %238, %239 : vector<2x32xf32>
      %cst_103 = arith.constant 5.000000e-01 : f32
      %241 = vector.broadcast %cst_103 : f32 to vector<2x32xf32>
      %242 = arith.mulf %241, %240 : vector<2x32xf32>
      %243 = vector.extract_strided_slice %237 {offsets = [0, 32], sizes = [2, 32], strides = [1, 1]} : vector<2x128xf32> to vector<2x32xf32>
      %cst_104 = arith.constant 1.000000e+00 : f32
      %244 = vector.broadcast %cst_104 : f32 to vector<2x32xf32>
      %245 = arith.addf %243, %244 : vector<2x32xf32>
      %cst_105 = arith.constant 5.000000e-01 : f32
      %246 = vector.broadcast %cst_105 : f32 to vector<2x32xf32>
      %247 = arith.mulf %246, %245 : vector<2x32xf32>
      %248 = vector.extract_strided_slice %237 {offsets = [0, 64], sizes = [2, 32], strides = [1, 1]} : vector<2x128xf32> to vector<2x32xf32>
      %249 = vector.extract_strided_slice %237 {offsets = [0, 96], sizes = [2, 32], strides = [1, 1]} : vector<2x128xf32> to vector<2x32xf32>
      %cst_106 = arith.constant 1.000000e+00 : f32
      %250 = vector.broadcast %cst_106 : f32 to vector<2x32xf32>
      %251 = arith.addf %249, %250 : vector<2x32xf32>
      %cst_107 = arith.constant 5.000000e-01 : f32
      %252 = vector.broadcast %cst_107 : f32 to vector<2x32xf32>
      %253 = arith.mulf %252, %251 : vector<2x32xf32>
      %254 = arith.mulf %247, %226 : vector<2x32xf32>
      %255 = arith.mulf %242, %248 : vector<2x32xf32>
      %256 = arith.addf %254, %255 : vector<2x32xf32>
      %257 = math.tanh %256 : vector<2x32xf32>
      %258 = arith.mulf %253, %257 : vector<2x32xf32>
      %259 = arith.truncf %258 : vector<2x32xf32> to vector<2x32xbf16>
      %c0_108 = arith.constant 0 : index
      %c14_109 = arith.constant 14 : index
      %c0_110 = arith.constant 0 : index
      %260 = vector.load %arg6[%c0_108, %c14_109, %c0_110] : memref<1x16x32xbf16, #tpu.memory_space<vmem>>, vector<1x2x32xbf16>
      %261 = vector.shape_cast %260 : vector<1x2x32xbf16> to vector<2x32xbf16>
      %262 = vector.shape_cast %259 : vector<2x32xbf16> to vector<1x2x32xbf16>
      tpu.vector_store %arg6[%c0_108, %c14_109, %c0_110], %262 {strides = array<i32>} : memref<1x16x32xbf16, #tpu.memory_space<vmem>>, vector<1x2x32xbf16>,
      %c0_111 = arith.constant 0 : index
      %c0_112 = arith.constant 0 : index
      %263 = vector.load %arg7[%c0_111, %c0_112] : memref<2x32xf32, #tpu.memory_space<vmem>>, vector<2x32xf32>
      tpu.vector_store %arg7[%c0_111, %c0_112], %258 {strides = array<i32>} : memref<2x32xf32, #tpu.memory_space<vmem>>, vector<2x32xf32>,
      %c0_113 = arith.constant 0 : index
      %c0_114 = arith.constant 0 : index
      %264 = vector.load %arg8[%c0_113, %c0_114] : memref<2x32xf32, #tpu.memory_space<vmem>>, vector<2x32xf32>
      tpu.vector_store %arg8[%c0_113, %c0_114], %256 {strides = array<i32>} : memref<2x32xf32, #tpu.memory_space<vmem>>, vector<2x32xf32>,
    } else {
    }
    %c1_i32 = arith.constant 1 : i32
    %18 = arith.cmpi eq, %arg0, %c1_i32 : i32
    %19 = arith.extui %18 : i1 to i32
    %c0_i32_17 = arith.constant 0 : i32
    %20 = arith.cmpi ne, %19, %c0_i32_17 : i32
    scf.if %20 {
      %c0_18 = arith.constant 0 : index
      %c0_19 = arith.constant 0 : index
      %21 = vector.load %arg7[%c0_18, %c0_19] : memref<2x32xf32, #tpu.memory_space<vmem>>, vector<2x32xf32>
      %c0_20 = arith.constant 0 : index
      %c0_21 = arith.constant 0 : index
      %22 = vector.load %arg8[%c0_20, %c0_21] : memref<2x32xf32, #tpu.memory_space<vmem>>, vector<2x32xf32>
      %c14 = arith.constant 14 : index
      %c0_22 = arith.constant 0 : index
      %23 = vector.load %arg9[%c14, %c0_22] : memref<16x128xf32, #tpu.memory_space<vmem>>, vector<2x128xf32>
      %24 = arith.truncf %21 : vector<2x32xf32> to vector<2x32xbf16>
      %cst_23 = arith.constant dense<0.000000e+00> : vector<2x128xf32>
      %25 = tpu.matmul %24, %14, %cst_23 {dimension_numbers = #tpu.dot_dimension_numbers<[1], [0], [0], [1], [0, 0, 1, 1], [], []>} : vector<2x32xbf16>, vector<32x128xbf16>, vector<2x128xf32> -> vector<2x128xf32>
      %26 = arith.addf %23, %25 : vector<2x128xf32>
      %27 = math.tanh %26 : vector<2x128xf32>
      %28 = vector.extract_strided_slice %27 {offsets = [0, 0], sizes = [2, 32], strides = [1, 1]} : vector<2x128xf32> to vector<2x32xf32>
      %cst_24 = arith.constant 1.000000e+00 : f32
      %29 = vector.broadcast %cst_24 : f32 to vector<2x32xf32>
      %30 = arith.addf %28, %29 : vector<2x32xf32>
      %cst_25 = arith.constant 5.000000e-01 : f32
      %31 = vector.broadcast %cst_25 : f32 to vector<2x32xf32>
      %32 = arith.mulf %31, %30 : vector<2x32xf32>
      %33 = vector.extract_strided_slice %27 {offsets = [0, 32], sizes = [2, 32], strides = [1, 1]} : vector<2x128xf32> to vector<2x32xf32>
      %cst_26 = arith.constant 1.000000e+00 : f32
      %34 = vector.broadcast %cst_26 : f32 to vector<2x32xf32>
      %35 = arith.addf %33, %34 : vector<2x32xf32>
      %cst_27 = arith.constant 5.000000e-01 : f32
      %36 = vector.broadcast %cst_27 : f32 to vector<2x32xf32>
      %37 = arith.mulf %36, %35 : vector<2x32xf32>
      %38 = vector.extract_strided_slice %27 {offsets = [0, 64], sizes = [2, 32], strides = [1, 1]} : vector<2x128xf32> to vector<2x32xf32>
      %39 = vector.extract_strided_slice %27 {offsets = [0, 96], sizes = [2, 32], strides = [1, 1]} : vector<2x128xf32> to vector<2x32xf32>
      %cst_28 = arith.constant 1.000000e+00 : f32
      %40 = vector.broadcast %cst_28 : f32 to vector<2x32xf32>
      %41 = arith.addf %39, %40 : vector<2x32xf32>
      %cst_29 = arith.constant 5.000000e-01 : f32
      %42 = vector.broadcast %cst_29 : f32 to vector<2x32xf32>
      %43 = arith.mulf %42, %41 : vector<2x32xf32>
      %44 = arith.mulf %37, %22 : vector<2x32xf32>
      %45 = arith.mulf %32, %38 : vector<2x32xf32>
      %46 = arith.addf %44, %45 : vector<2x32xf32>
      %47 = math.tanh %46 : vector<2x32xf32>
      %48 = arith.mulf %43, %47 : vector<2x32xf32>
      %49 = arith.truncf %48 : vector<2x32xf32> to vector<2x32xbf16>
      %c0_30 = arith.constant 0 : index
      %c14_31 = arith.constant 14 : index
      %c0_32 = arith.constant 0 : index
      %50 = vector.load %arg6[%c0_30, %c14_31, %c0_32] : memref<1x16x32xbf16, #tpu.memory_space<vmem>>, vector<1x2x32xbf16>
      %51 = vector.shape_cast %50 : vector<1x2x32xbf16> to vector<2x32xbf16>
      %52 = vector.shape_cast %49 : vector<2x32xbf16> to vector<1x2x32xbf16>
      tpu.vector_store %arg6[%c0_30, %c14_31, %c0_32], %52 {strides = array<i32>} : memref<1x16x32xbf16, #tpu.memory_space<vmem>>, vector<1x2x32xbf16>,
      %c12 = arith.constant 12 : index
      %c0_33 = arith.constant 0 : index
      %53 = vector.load %arg9[%c12, %c0_33] : memref<16x128xf32, #tpu.memory_space<vmem>>, vector<2x128xf32>
      %54 = arith.truncf %48 : vector<2x32xf32> to vector<2x32xbf16>
      %cst_34 = arith.constant dense<0.000000e+00> : vector<2x128xf32>
      %55 = tpu.matmul %54, %14, %cst_34 {dimension_numbers = #tpu.dot_dimension_numbers<[1], [0], [0], [1], [0, 0, 1, 1], [], []>} : vector<2x32xbf16>, vector<32x128xbf16>, vector<2x128xf32> -> vector<2x128xf32>
      %56 = arith.addf %53, %55 : vector<2x128xf32>
      %57 = math.tanh %56 : vector<2x128xf32>
      %58 = vector.extract_strided_slice %57 {offsets = [0, 0], sizes = [2, 32], strides = [1, 1]} : vector<2x128xf32> to vector<2x32xf32>
      %cst_35 = arith.constant 1.000000e+00 : f32
      %59 = vector.broadcast %cst_35 : f32 to vector<2x32xf32>
      %60 = arith.addf %58, %59 : vector<2x32xf32>
      %cst_36 = arith.constant 5.000000e-01 : f32
      %61 = vector.broadcast %cst_36 : f32 to vector<2x32xf32>
      %62 = arith.mulf %61, %60 : vector<2x32xf32>
      %63 = vector.extract_strided_slice %57 {offsets = [0, 32], sizes = [2, 32], strides = [1, 1]} : vector<2x128xf32> to vector<2x32xf32>
      %cst_37 = arith.constant 1.000000e+00 : f32
      %64 = vector.broadcast %cst_37 : f32 to vector<2x32xf32>
      %65 = arith.addf %63, %64 : vector<2x32xf32>
      %cst_38 = arith.constant 5.000000e-01 : f32
      %66 = vector.broadcast %cst_38 : f32 to vector<2x32xf32>
      %67 = arith.mulf %66, %65 : vector<2x32xf32>
      %68 = vector.extract_strided_slice %57 {offsets = [0, 64], sizes = [2, 32], strides = [1, 1]} : vector<2x128xf32> to vector<2x32xf32>
      %69 = vector.extract_strided_slice %57 {offsets = [0, 96], sizes = [2, 32], strides = [1, 1]} : vector<2x128xf32> to vector<2x32xf32>
      %cst_39 = arith.constant 1.000000e+00 : f32
      %70 = vector.broadcast %cst_39 : f32 to vector<2x32xf32>
      %71 = arith.addf %69, %70 : vector<2x32xf32>
      %cst_40 = arith.constant 5.000000e-01 : f32
      %72 = vector.broadcast %cst_40 : f32 to vector<2x32xf32>
      %73 = arith.mulf %72, %71 : vector<2x32xf32>
      %74 = arith.mulf %67, %46 : vector<2x32xf32>
      %75 = arith.mulf %62, %68 : vector<2x32xf32>
      %76 = arith.addf %74, %75 : vector<2x32xf32>
      %77 = math.tanh %76 : vector<2x32xf32>
      %78 = arith.mulf %73, %77 : vector<2x32xf32>
      %79 = arith.truncf %78 : vector<2x32xf32> to vector<2x32xbf16>
      %c0_41 = arith.constant 0 : index
      %c12_42 = arith.constant 12 : index
      %c0_43 = arith.constant 0 : index
      %80 = vector.load %arg6[%c0_41, %c12_42, %c0_43] : memref<1x16x32xbf16, #tpu.memory_space<vmem>>, vector<1x2x32xbf16>
      %81 = vector.shape_cast %80 : vector<1x2x32xbf16> to vector<2x32xbf16>
      %82 = vector.shape_cast %79 : vector<2x32xbf16> to vector<1x2x32xbf16>
      tpu.vector_store %arg6[%c0_41, %c12_42, %c0_43], %82 {strides = array<i32>} : memref<1x16x32xbf16, #tpu.memory_space<vmem>>, vector<1x2x32xbf16>,
      %c10 = arith.constant 10 : index
      %c0_44 = arith.constant 0 : index
      %83 = vector.load %arg9[%c10, %c0_44] : memref<16x128xf32, #tpu.memory_space<vmem>>, vector<2x128xf32>
      %84 = arith.truncf %78 : vector<2x32xf32> to vector<2x32xbf16>
      %cst_45 = arith.constant dense<0.000000e+00> : vector<2x128xf32>
      %85 = tpu.matmul %84, %14, %cst_45 {dimension_numbers = #tpu.dot_dimension_numbers<[1], [0], [0], [1], [0, 0, 1, 1], [], []>} : vector<2x32xbf16>, vector<32x128xbf16>, vector<2x128xf32> -> vector<2x128xf32>
      %86 = arith.addf %83, %85 : vector<2x128xf32>
      %87 = math.tanh %86 : vector<2x128xf32>
      %88 = vector.extract_strided_slice %87 {offsets = [0, 0], sizes = [2, 32], strides = [1, 1]} : vector<2x128xf32> to vector<2x32xf32>
      %cst_46 = arith.constant 1.000000e+00 : f32
      %89 = vector.broadcast %cst_46 : f32 to vector<2x32xf32>
      %90 = arith.addf %88, %89 : vector<2x32xf32>
      %cst_47 = arith.constant 5.000000e-01 : f32
      %91 = vector.broadcast %cst_47 : f32 to vector<2x32xf32>
      %92 = arith.mulf %91, %90 : vector<2x32xf32>
      %93 = vector.extract_strided_slice %87 {offsets = [0, 32], sizes = [2, 32], strides = [1, 1]} : vector<2x128xf32> to vector<2x32xf32>
      %cst_48 = arith.constant 1.000000e+00 : f32
      %94 = vector.broadcast %cst_48 : f32 to vector<2x32xf32>
      %95 = arith.addf %93, %94 : vector<2x32xf32>
      %cst_49 = arith.constant 5.000000e-01 : f32
      %96 = vector.broadcast %cst_49 : f32 to vector<2x32xf32>
      %97 = arith.mulf %96, %95 : vector<2x32xf32>
      %98 = vector.extract_strided_slice %87 {offsets = [0, 64], sizes = [2, 32], strides = [1, 1]} : vector<2x128xf32> to vector<2x32xf32>
      %99 = vector.extract_strided_slice %87 {offsets = [0, 96], sizes = [2, 32], strides = [1, 1]} : vector<2x128xf32> to vector<2x32xf32>
      %cst_50 = arith.constant 1.000000e+00 : f32
      %100 = vector.broadcast %cst_50 : f32 to vector<2x32xf32>
      %101 = arith.addf %99, %100 : vector<2x32xf32>
      %cst_51 = arith.constant 5.000000e-01 : f32
      %102 = vector.broadcast %cst_51 : f32 to vector<2x32xf32>
      %103 = arith.mulf %102, %101 : vector<2x32xf32>
      %104 = arith.mulf %97, %76 : vector<2x32xf32>
      %105 = arith.mulf %92, %98 : vector<2x32xf32>
      %106 = arith.addf %104, %105 : vector<2x32xf32>
      %107 = math.tanh %106 : vector<2x32xf32>
      %108 = arith.mulf %103, %107 : vector<2x32xf32>
      %109 = arith.truncf %108 : vector<2x32xf32> to vector<2x32xbf16>
      %c0_52 = arith.constant 0 : index
      %c10_53 = arith.constant 10 : index
      %c0_54 = arith.constant 0 : index
      %110 = vector.load %arg6[%c0_52, %c10_53, %c0_54] : memref<1x16x32xbf16, #tpu.memory_space<vmem>>, vector<1x2x32xbf16>
      %111 = vector.shape_cast %110 : vector<1x2x32xbf16> to vector<2x32xbf16>
      %112 = vector.shape_cast %109 : vector<2x32xbf16> to vector<1x2x32xbf16>
      tpu.vector_store %arg6[%c0_52, %c10_53, %c0_54], %112 {strides = array<i32>} : memref<1x16x32xbf16, #tpu.memory_space<vmem>>, vector<1x2x32xbf16>,
      %c8 = arith.constant 8 : index
      %c0_55 = arith.constant 0 : index
      %113 = vector.load %arg9[%c8, %c0_55] : memref<16x128xf32, #tpu.memory_space<vmem>>, vector<2x128xf32>
      %114 = arith.truncf %108 : vector<2x32xf32> to vector<2x32xbf16>
      %cst_56 = arith.constant dense<0.000000e+00> : vector<2x128xf32>
      %115 = tpu.matmul %114, %14, %cst_56 {dimension_numbers = #tpu.dot_dimension_numbers<[1], [0], [0], [1], [0, 0, 1, 1], [], []>} : vector<2x32xbf16>, vector<32x128xbf16>, vector<2x128xf32> -> vector<2x128xf32>
      %116 = arith.addf %113, %115 : vector<2x128xf32>
      %117 = math.tanh %116 : vector<2x128xf32>
      %118 = vector.extract_strided_slice %117 {offsets = [0, 0], sizes = [2, 32], strides = [1, 1]} : vector<2x128xf32> to vector<2x32xf32>
      %cst_57 = arith.constant 1.000000e+00 : f32
      %119 = vector.broadcast %cst_57 : f32 to vector<2x32xf32>
      %120 = arith.addf %118, %119 : vector<2x32xf32>
      %cst_58 = arith.constant 5.000000e-01 : f32
      %121 = vector.broadcast %cst_58 : f32 to vector<2x32xf32>
      %122 = arith.mulf %121, %120 : vector<2x32xf32>
      %123 = vector.extract_strided_slice %117 {offsets = [0, 32], sizes = [2, 32], strides = [1, 1]} : vector<2x128xf32> to vector<2x32xf32>
      %cst_59 = arith.constant 1.000000e+00 : f32
      %124 = vector.broadcast %cst_59 : f32 to vector<2x32xf32>
      %125 = arith.addf %123, %124 : vector<2x32xf32>
      %cst_60 = arith.constant 5.000000e-01 : f32
      %126 = vector.broadcast %cst_60 : f32 to vector<2x32xf32>
      %127 = arith.mulf %126, %125 : vector<2x32xf32>
      %128 = vector.extract_strided_slice %117 {offsets = [0, 64], sizes = [2, 32], strides = [1, 1]} : vector<2x128xf32> to vector<2x32xf32>
      %129 = vector.extract_strided_slice %117 {offsets = [0, 96], sizes = [2, 32], strides = [1, 1]} : vector<2x128xf32> to vector<2x32xf32>
      %cst_61 = arith.constant 1.000000e+00 : f32
      %130 = vector.broadcast %cst_61 : f32 to vector<2x32xf32>
      %131 = arith.addf %129, %130 : vector<2x32xf32>
      %cst_62 = arith.constant 5.000000e-01 : f32
      %132 = vector.broadcast %cst_62 : f32 to vector<2x32xf32>
      %133 = arith.mulf %132, %131 : vector<2x32xf32>
      %134 = arith.mulf %127, %106 : vector<2x32xf32>
      %135 = arith.mulf %122, %128 : vector<2x32xf32>
      %136 = arith.addf %134, %135 : vector<2x32xf32>
      %137 = math.tanh %136 : vector<2x32xf32>
      %138 = arith.mulf %133, %137 : vector<2x32xf32>
      %139 = arith.truncf %138 : vector<2x32xf32> to vector<2x32xbf16>
      %c0_63 = arith.constant 0 : index
      %c8_64 = arith.constant 8 : index
      %c0_65 = arith.constant 0 : index
      %140 = vector.load %arg6[%c0_63, %c8_64, %c0_65] : memref<1x16x32xbf16, #tpu.memory_space<vmem>>, vector<1x2x32xbf16>
      %141 = vector.shape_cast %140 : vector<1x2x32xbf16> to vector<2x32xbf16>
      %142 = vector.shape_cast %139 : vector<2x32xbf16> to vector<1x2x32xbf16>
      tpu.vector_store %arg6[%c0_63, %c8_64, %c0_65], %142 {strides = array<i32>} : memref<1x16x32xbf16, #tpu.memory_space<vmem>>, vector<1x2x32xbf16>,
      %c6 = arith.constant 6 : index
      %c0_66 = arith.constant 0 : index
      %143 = vector.load %arg9[%c6, %c0_66] : memref<16x128xf32, #tpu.memory_space<vmem>>, vector<2x128xf32>
      %144 = arith.truncf %138 : vector<2x32xf32> to vector<2x32xbf16>
      %cst_67 = arith.constant dense<0.000000e+00> : vector<2x128xf32>
      %145 = tpu.matmul %144, %14, %cst_67 {dimension_numbers = #tpu.dot_dimension_numbers<[1], [0], [0], [1], [0, 0, 1, 1], [], []>} : vector<2x32xbf16>, vector<32x128xbf16>, vector<2x128xf32> -> vector<2x128xf32>
      %146 = arith.addf %143, %145 : vector<2x128xf32>
      %147 = math.tanh %146 : vector<2x128xf32>
      %148 = vector.extract_strided_slice %147 {offsets = [0, 0], sizes = [2, 32], strides = [1, 1]} : vector<2x128xf32> to vector<2x32xf32>
      %cst_68 = arith.constant 1.000000e+00 : f32
      %149 = vector.broadcast %cst_68 : f32 to vector<2x32xf32>
      %150 = arith.addf %148, %149 : vector<2x32xf32>
      %cst_69 = arith.constant 5.000000e-01 : f32
      %151 = vector.broadcast %cst_69 : f32 to vector<2x32xf32>
      %152 = arith.mulf %151, %150 : vector<2x32xf32>
      %153 = vector.extract_strided_slice %147 {offsets = [0, 32], sizes = [2, 32], strides = [1, 1]} : vector<2x128xf32> to vector<2x32xf32>
      %cst_70 = arith.constant 1.000000e+00 : f32
      %154 = vector.broadcast %cst_70 : f32 to vector<2x32xf32>
      %155 = arith.addf %153, %154 : vector<2x32xf32>
      %cst_71 = arith.constant 5.000000e-01 : f32
      %156 = vector.broadcast %cst_71 : f32 to vector<2x32xf32>
      %157 = arith.mulf %156, %155 : vector<2x32xf32>
      %158 = vector.extract_strided_slice %147 {offsets = [0, 64], sizes = [2, 32], strides = [1, 1]} : vector<2x128xf32> to vector<2x32xf32>
      %159 = vector.extract_strided_slice %147 {offsets = [0, 96], sizes = [2, 32], strides = [1, 1]} : vector<2x128xf32> to vector<2x32xf32>
      %cst_72 = arith.constant 1.000000e+00 : f32
      %160 = vector.broadcast %cst_72 : f32 to vector<2x32xf32>
      %161 = arith.addf %159, %160 : vector<2x32xf32>
      %cst_73 = arith.constant 5.000000e-01 : f32
      %162 = vector.broadcast %cst_73 : f32 to vector<2x32xf32>
      %163 = arith.mulf %162, %161 : vector<2x32xf32>
      %164 = arith.mulf %157, %136 : vector<2x32xf32>
      %165 = arith.mulf %152, %158 : vector<2x32xf32>
      %166 = arith.addf %164, %165 : vector<2x32xf32>
      %167 = math.tanh %166 : vector<2x32xf32>
      %168 = arith.mulf %163, %167 : vector<2x32xf32>
      %169 = arith.truncf %168 : vector<2x32xf32> to vector<2x32xbf16>
      %c0_74 = arith.constant 0 : index
      %c6_75 = arith.constant 6 : index
      %c0_76 = arith.constant 0 : index
      %170 = vector.load %arg6[%c0_74, %c6_75, %c0_76] : memref<1x16x32xbf16, #tpu.memory_space<vmem>>, vector<1x2x32xbf16>
      %171 = vector.shape_cast %170 : vector<1x2x32xbf16> to vector<2x32xbf16>
      %172 = vector.shape_cast %169 : vector<2x32xbf16> to vector<1x2x32xbf16>
      tpu.vector_store %arg6[%c0_74, %c6_75, %c0_76], %172 {strides = array<i32>} : memref<1x16x32xbf16, #tpu.memory_space<vmem>>, vector<1x2x32xbf16>,
      %c4 = arith.constant 4 : index
      %c0_77 = arith.constant 0 : index
      %173 = vector.load %arg9[%c4, %c0_77] : memref<16x128xf32, #tpu.memory_space<vmem>>, vector<2x128xf32>
      %174 = arith.truncf %168 : vector<2x32xf32> to vector<2x32xbf16>
      %cst_78 = arith.constant dense<0.000000e+00> : vector<2x128xf32>
      %175 = tpu.matmul %174, %14, %cst_78 {dimension_numbers = #tpu.dot_dimension_numbers<[1], [0], [0], [1], [0, 0, 1, 1], [], []>} : vector<2x32xbf16>, vector<32x128xbf16>, vector<2x128xf32> -> vector<2x128xf32>
      %176 = arith.addf %173, %175 : vector<2x128xf32>
      %177 = math.tanh %176 : vector<2x128xf32>
      %178 = vector.extract_strided_slice %177 {offsets = [0, 0], sizes = [2, 32], strides = [1, 1]} : vector<2x128xf32> to vector<2x32xf32>
      %cst_79 = arith.constant 1.000000e+00 : f32
      %179 = vector.broadcast %cst_79 : f32 to vector<2x32xf32>
      %180 = arith.addf %178, %179 : vector<2x32xf32>
      %cst_80 = arith.constant 5.000000e-01 : f32
      %181 = vector.broadcast %cst_80 : f32 to vector<2x32xf32>
      %182 = arith.mulf %181, %180 : vector<2x32xf32>
      %183 = vector.extract_strided_slice %177 {offsets = [0, 32], sizes = [2, 32], strides = [1, 1]} : vector<2x128xf32> to vector<2x32xf32>
      %cst_81 = arith.constant 1.000000e+00 : f32
      %184 = vector.broadcast %cst_81 : f32 to vector<2x32xf32>
      %185 = arith.addf %183, %184 : vector<2x32xf32>
      %cst_82 = arith.constant 5.000000e-01 : f32
      %186 = vector.broadcast %cst_82 : f32 to vector<2x32xf32>
      %187 = arith.mulf %186, %185 : vector<2x32xf32>
      %188 = vector.extract_strided_slice %177 {offsets = [0, 64], sizes = [2, 32], strides = [1, 1]} : vector<2x128xf32> to vector<2x32xf32>
      %189 = vector.extract_strided_slice %177 {offsets = [0, 96], sizes = [2, 32], strides = [1, 1]} : vector<2x128xf32> to vector<2x32xf32>
      %cst_83 = arith.constant 1.000000e+00 : f32
      %190 = vector.broadcast %cst_83 : f32 to vector<2x32xf32>
      %191 = arith.addf %189, %190 : vector<2x32xf32>
      %cst_84 = arith.constant 5.000000e-01 : f32
      %192 = vector.broadcast %cst_84 : f32 to vector<2x32xf32>
      %193 = arith.mulf %192, %191 : vector<2x32xf32>
      %194 = arith.mulf %187, %166 : vector<2x32xf32>
      %195 = arith.mulf %182, %188 : vector<2x32xf32>
      %196 = arith.addf %194, %195 : vector<2x32xf32>
      %197 = math.tanh %196 : vector<2x32xf32>
      %198 = arith.mulf %193, %197 : vector<2x32xf32>
      %199 = arith.truncf %198 : vector<2x32xf32> to vector<2x32xbf16>
      %c0_85 = arith.constant 0 : index
      %c4_86 = arith.constant 4 : index
      %c0_87 = arith.constant 0 : index
      %200 = vector.load %arg6[%c0_85, %c4_86, %c0_87] : memref<1x16x32xbf16, #tpu.memory_space<vmem>>, vector<1x2x32xbf16>
      %201 = vector.shape_cast %200 : vector<1x2x32xbf16> to vector<2x32xbf16>
      %202 = vector.shape_cast %199 : vector<2x32xbf16> to vector<1x2x32xbf16>
      tpu.vector_store %arg6[%c0_85, %c4_86, %c0_87], %202 {strides = array<i32>} : memref<1x16x32xbf16, #tpu.memory_space<vmem>>, vector<1x2x32xbf16>,
      %c2 = arith.constant 2 : index
      %c0_88 = arith.constant 0 : index
      %203 = vector.load %arg9[%c2, %c0_88] : memref<16x128xf32, #tpu.memory_space<vmem>>, vector<2x128xf32>
      %204 = arith.truncf %198 : vector<2x32xf32> to vector<2x32xbf16>
      %cst_89 = arith.constant dense<0.000000e+00> : vector<2x128xf32>
      %205 = tpu.matmul %204, %14, %cst_89 {dimension_numbers = #tpu.dot_dimension_numbers<[1], [0], [0], [1], [0, 0, 1, 1], [], []>} : vector<2x32xbf16>, vector<32x128xbf16>, vector<2x128xf32> -> vector<2x128xf32>
      %206 = arith.addf %203, %205 : vector<2x128xf32>
      %207 = math.tanh %206 : vector<2x128xf32>
      %208 = vector.extract_strided_slice %207 {offsets = [0, 0], sizes = [2, 32], strides = [1, 1]} : vector<2x128xf32> to vector<2x32xf32>
      %cst_90 = arith.constant 1.000000e+00 : f32
      %209 = vector.broadcast %cst_90 : f32 to vector<2x32xf32>
      %210 = arith.addf %208, %209 : vector<2x32xf32>
      %cst_91 = arith.constant 5.000000e-01 : f32
      %211 = vector.broadcast %cst_91 : f32 to vector<2x32xf32>
      %212 = arith.mulf %211, %210 : vector<2x32xf32>
      %213 = vector.extract_strided_slice %207 {offsets = [0, 32], sizes = [2, 32], strides = [1, 1]} : vector<2x128xf32> to vector<2x32xf32>
      %cst_92 = arith.constant 1.000000e+00 : f32
      %214 = vector.broadcast %cst_92 : f32 to vector<2x32xf32>
      %215 = arith.addf %213, %214 : vector<2x32xf32>
      %cst_93 = arith.constant 5.000000e-01 : f32
      %216 = vector.broadcast %cst_93 : f32 to vector<2x32xf32>
      %217 = arith.mulf %216, %215 : vector<2x32xf32>
      %218 = vector.extract_strided_slice %207 {offsets = [0, 64], sizes = [2, 32], strides = [1, 1]} : vector<2x128xf32> to vector<2x32xf32>
      %219 = vector.extract_strided_slice %207 {offsets = [0, 96], sizes = [2, 32], strides = [1, 1]} : vector<2x128xf32> to vector<2x32xf32>
      %cst_94 = arith.constant 1.000000e+00 : f32
      %220 = vector.broadcast %cst_94 : f32 to vector<2x32xf32>
      %221 = arith.addf %219, %220 : vector<2x32xf32>
      %cst_95 = arith.constant 5.000000e-01 : f32
      %222 = vector.broadcast %cst_95 : f32 to vector<2x32xf32>
      %223 = arith.mulf %222, %221 : vector<2x32xf32>
      %224 = arith.mulf %217, %196 : vector<2x32xf32>
      %225 = arith.mulf %212, %218 : vector<2x32xf32>
      %226 = arith.addf %224, %225 : vector<2x32xf32>
      %227 = math.tanh %226 : vector<2x32xf32>
      %228 = arith.mulf %223, %227 : vector<2x32xf32>
      %229 = arith.truncf %228 : vector<2x32xf32> to vector<2x32xbf16>
      %c0_96 = arith.constant 0 : index
      %c2_97 = arith.constant 2 : index
      %c0_98 = arith.constant 0 : index
      %230 = vector.load %arg6[%c0_96, %c2_97, %c0_98] : memref<1x16x32xbf16, #tpu.memory_space<vmem>>, vector<1x2x32xbf16>
      %231 = vector.shape_cast %230 : vector<1x2x32xbf16> to vector<2x32xbf16>
      %232 = vector.shape_cast %229 : vector<2x32xbf16> to vector<1x2x32xbf16>
      tpu.vector_store %arg6[%c0_96, %c2_97, %c0_98], %232 {strides = array<i32>} : memref<1x16x32xbf16, #tpu.memory_space<vmem>>, vector<1x2x32xbf16>,
      %c0_99 = arith.constant 0 : index
      %c0_100 = arith.constant 0 : index
      %233 = vector.load %arg9[%c0_99, %c0_100] : memref<16x128xf32, #tpu.memory_space<vmem>>, vector<2x128xf32>
      %234 = arith.truncf %228 : vector<2x32xf32> to vector<2x32xbf16>
      %cst_101 = arith.constant dense<0.000000e+00> : vector<2x128xf32>
      %235 = tpu.matmul %234, %14, %cst_101 {dimension_numbers = #tpu.dot_dimension_numbers<[1], [0], [0], [1], [0, 0, 1, 1], [], []>} : vector<2x32xbf16>, vector<32x128xbf16>, vector<2x128xf32> -> vector<2x128xf32>
      %236 = arith.addf %233, %235 : vector<2x128xf32>
      %237 = math.tanh %236 : vector<2x128xf32>
      %238 = vector.extract_strided_slice %237 {offsets = [0, 0], sizes = [2, 32], strides = [1, 1]} : vector<2x128xf32> to vector<2x32xf32>
      %cst_102 = arith.constant 1.000000e+00 : f32
      %239 = vector.broadcast %cst_102 : f32 to vector<2x32xf32>
      %240 = arith.addf %238, %239 : vector<2x32xf32>
      %cst_103 = arith.constant 5.000000e-01 : f32
      %241 = vector.broadcast %cst_103 : f32 to vector<2x32xf32>
      %242 = arith.mulf %241, %240 : vector<2x32xf32>
      %243 = vector.extract_strided_slice %237 {offsets = [0, 32], sizes = [2, 32], strides = [1, 1]} : vector<2x128xf32> to vector<2x32xf32>
      %cst_104 = arith.constant 1.000000e+00 : f32
      %244 = vector.broadcast %cst_104 : f32 to vector<2x32xf32>
      %245 = arith.addf %243, %244 : vector<2x32xf32>
      %cst_105 = arith.constant 5.000000e-01 : f32
      %246 = vector.broadcast %cst_105 : f32 to vector<2x32xf32>
      %247 = arith.mulf %246, %245 : vector<2x32xf32>
      %248 = vector.extract_strided_slice %237 {offsets = [0, 64], sizes = [2, 32], strides = [1, 1]} : vector<2x128xf32> to vector<2x32xf32>
      %249 = vector.extract_strided_slice %237 {offsets = [0, 96], sizes = [2, 32], strides = [1, 1]} : vector<2x128xf32> to vector<2x32xf32>
      %cst_106 = arith.constant 1.000000e+00 : f32
      %250 = vector.broadcast %cst_106 : f32 to vector<2x32xf32>
      %251 = arith.addf %249, %250 : vector<2x32xf32>
      %cst_107 = arith.constant 5.000000e-01 : f32
      %252 = vector.broadcast %cst_107 : f32 to vector<2x32xf32>
      %253 = arith.mulf %252, %251 : vector<2x32xf32>
      %254 = arith.mulf %247, %226 : vector<2x32xf32>
      %255 = arith.mulf %242, %248 : vector<2x32xf32>
      %256 = arith.addf %254, %255 : vector<2x32xf32>
      %257 = math.tanh %256 : vector<2x32xf32>
      %258 = arith.mulf %253, %257 : vector<2x32xf32>
      %259 = arith.truncf %258 : vector<2x32xf32> to vector<2x32xbf16>
      %c0_108 = arith.constant 0 : index
      %c0_109 = arith.constant 0 : index
      %c0_110 = arith.constant 0 : index
      %260 = vector.load %arg6[%c0_108, %c0_109, %c0_110] : memref<1x16x32xbf16, #tpu.memory_space<vmem>>, vector<1x2x32xbf16>
      %261 = vector.shape_cast %260 : vector<1x2x32xbf16> to vector<2x32xbf16>
      %262 = vector.shape_cast %259 : vector<2x32xbf16> to vector<1x2x32xbf16>
      tpu.vector_store %arg6[%c0_108, %c0_109, %c0_110], %262 {strides = array<i32>} : memref<1x16x32xbf16, #tpu.memory_space<vmem>>, vector<1x2x32xbf16>,
      %c0_111 = arith.constant 0 : index
      %c0_112 = arith.constant 0 : index
      %263 = vector.load %arg7[%c0_111, %c0_112] : memref<2x32xf32, #tpu.memory_space<vmem>>, vector<2x32xf32>
      tpu.vector_store %arg7[%c0_111, %c0_112], %258 {strides = array<i32>} : memref<2x32xf32, #tpu.memory_space<vmem>>, vector<2x32xf32>,
      %c0_113 = arith.constant 0 : index
      %c0_114 = arith.constant 0 : index
      %264 = vector.load %arg8[%c0_113, %c0_114] : memref<2x32xf32, #tpu.memory_space<vmem>>, vector<2x32xf32>
      tpu.vector_store %arg8[%c0_113, %c0_114], %256 {strides = array<i32>} : memref<2x32xf32, #tpu.memory_space<vmem>>, vector<2x32xf32>,
    } else {
    }
    return
  }
  func.func @transform_0(%arg0: i32, %arg1: i32) -> (i32, i32, i32) {
    %c2_i32 = arith.constant 2 : i32
    %0 = arith.muli %c2_i32, %arg1 : i32
    %c0_i32 = arith.constant 0 : i32
    %1 = arith.subi %c0_i32, %0 : i32
    %2 = arith.muli %arg0, %1 : i32
    %3 = arith.addi %arg1, %2 : i32
    %c0_i32_0 = arith.constant 0 : i32
    %c0_i32_1 = arith.constant 0 : i32
    %c0_i32_2 = arith.constant 0 : i32
    return %c0_i32_0, %3, %c0_i32_1 : i32, i32, i32
  }
  func.func @transform_1(%arg0: i32, %arg1: i32) -> (i32, i32, i32, i32) {
    %c0_i32 = arith.constant 0 : i32
    %c0_i32_0 = arith.constant 0 : i32
    %c0_i32_1 = arith.constant 0 : i32
    %c0_i32_2 = arith.constant 0 : i32
    return %arg0, %c0_i32, %c0_i32_0, %c0_i32_1 : i32, i32, i32, i32
  }
  func.func @transform_2(%arg0: i32, %arg1: i32) -> (i32, i32, i32) {
    %c0_i32 = arith.constant 0 : i32
    %c0_i32_0 = arith.constant 0 : i32
    %c0_i32_1 = arith.constant 0 : i32
    return %arg0, %c0_i32, %c0_i32_0 : i32, i32, i32
  }
  func.func @transform_3(%arg0: i32, %arg1: i32) -> (i32, i32, i32) {
    %c0_i32 = arith.constant 0 : i32
    %c0_i32_0 = arith.constant 0 : i32
    %c0_i32_1 = arith.constant 0 : i32
    return %arg0, %c0_i32, %c0_i32_0 : i32, i32, i32
  }
  func.func @transform_4(%arg0: i32, %arg1: i32) -> (i32, i32, i32) {
    %c2_i32 = arith.constant 2 : i32
    %0 = arith.muli %c2_i32, %arg1 : i32
    %c0_i32 = arith.constant 0 : i32
    %1 = arith.subi %c0_i32, %0 : i32
    %2 = arith.muli %arg0, %1 : i32
    %3 = arith.addi %arg1, %2 : i32
    %c0_i32_0 = arith.constant 0 : i32
    %c0_i32_1 = arith.constant 0 : i32
    return %arg0, %3, %c0_i32_0 : i32, i32, i32
  }
}

</mosaic_0001>

<bundles_post_ra>
// kernel: tpu_custom_call.1
= control target key start
LH: loop header
LB: loop body
LE: loop exit
PB: predicated region body
PF: predicated region fallthrough
CT: control target
= control target key end

     0   :  { %s3045_s0 = inlined_call_operand.hbm [shape: bf16[1,16,32], index: 0, kind: input, shape index: {}]   ;;  %s3046_s1 = inlined_call_operand.hbm [shape: bf16[2,1,32,128], index: 1, kind: input, shape index: {}]   ;;  %s3047_s2 = inlined_call_operand.hbm [shape: bf16[2,32,128], index: 2, kind: input, shape index: {}]   ;;  %s3048_s3 = inlined_call_operand.vmem [shape: f32[2,1,128], index: 3, kind: input, shape index: {}]   ;;  %s3049_s4 = inlined_call_operand.hbm [shape: bf16[2,16,32], index: 4, kind: output, shape index: {}]  }
   0x1   :  { %3052 = sst [smem:[#allocation15_spill]] %s3046_s1 }
   0x2   :  { %9 = vsyncpa [#allocation6], 0 }
   0x3   :  { %11 = vsyncpa [#allocation6 + $0x1], 0 }
   0x4   :  { %12 = vsyncpa [#allocation9], 0 }
   0x5   :  { %14 = vsyncpa [#allocation9 + $0x1], 0 }
   0x6   :  { %15 = vsyncpa [#allocation7], 0 }
   0x7   :  { %17 = vsyncpa [#allocation7 + $0x1], 0  ;;  %s2525_s15 = smov 0   ;;  %s2527_s16 = smov 0  }
   0x8   :  { %s2529_s17 = smov 0   ;;  %s2531_s18 = smov 0  }
   0x9   :  { %s2533_s19 = smov 0   ;;  %s2535_s20 = smov 0  }
   0xa LB: > { %s2556_s21 = sadd.s32 4294967295, %s2478_s20   ;;  %s1883_s22 = sadd.s32 4294967294, %s2478_s20   ;;  %s2478_s20 = sphi %s2535_s20, %s23_s20   ;;  %s2474_s19 = sphi %s2533_s19, %s3070_s19   ;;  %s2470_s18 = sphi %s2531_s18, %s3069_s18   ;;  %s2466_s17 = sphi %s2529_s17, %s3068_s17   ;;  %s2462_s16 = sphi %s2527_s16, %s3067_s16   ;;  %s2458_s15 = sphi %s2525_s15, %s3066_s15  }
   0xb   : > { %s35_s23 = sadd.s32 1, %s2474_s19  ;;  %s76_s24 = sadd.s32 1, %s2466_s17 }
   0xc   : > { %p37_p0 = scmp.ge.s32.totalorder %s35_s23, 2  ;;  %p83_p1 = scmp.ne.s32.totalorder %s2466_s17, %s2462_s16 }
   0xd   : > { %p84_p2 = scmp.eq.s32.totalorder %s2478_s20, 0  ;;  %p89_p3 = scmp.ne.s32.totalorder %s2462_s16, %s2458_s15 }
   0xe   : > { %s3072_s23 = smov (%p37_p0, %s35_s23), 0  ;;  %p3050_p5 = scmp.eq.s32.totalorder %s2556_s21, 0 }
   0xf   : > { %p2570_p4 = por %p84_p2, %p83_p1  ;;  %s73_s26 = ssub.s32 %s2474_s19, %s3072_s23 }
  0x10   : > { %p175_p6 = scmp.eq.s32.totalorder %s2556_s21, 1  ;;  %p74_p7 = scmp.eq.s32.totalorder %s73_s26, 0 }
  0x11   : > { %p2580_p8 = por %p3050_p5, %p89_p3  ;;  %p181_p10 = scmp.eq.s32.totalorder %s1883_s22, 1 }
  0x12   : > { %p2584_p9 = por %p175_p6, %p83_p1  ;;  %p2176_p13 = scmp.lt.s32.totalorder %s2478_s20, 2 }
  0x13   : > { %s2589_s29 = scalar_select %p74_p7, %s2466_s17, %s76_s24  }
  0x14   : > { %s3055_s28 = scalar_select %p2584_p9, 1, 0 }
  0x15   : > { %p2591_p11 = por %p181_p10, %p89_p3  ;;  %s226_s5 = sand.u32 1, %s2478_s20  }
  0x16   : > { %s228_s6 = sand.u32 1, %s2466_s17   ;;  %s1946_s8 = sshll.u32 %s2474_s19, 8 }
  0x17   : > { %s3056_s30 = scalar_select %p2591_p11, 1, 0 }
  0x18   : > { %s1887_s7 = sshll.u32 %s228_s6, 4  ;;  %s3057_s1 = sld [smem:[#allocation15_spill]] }
  0x19   : > { %s230_s12 = scalar_lea.vmem [#allocation8], %s1887_s7  ;;  %p2609_p0 = pnand %p2176_p13, %p2570_p4 }
  0x1a   : > { %s237_s13 = sshll.u32 %s230_s12, 4  ;;  %s2616_s26 = scalar_lea.hbm %s3047_s2, %s1946_s8  ;;  %s238_s13 = int_to_ptr.vmem [resolvable:$true] %s237_s13 }
  0x1b   : > { %s251_s6 = scalar_lea.vmem [#allocation10], %s1887_s7  ;;  %s2618_s10 = scalar_lea.sflag [#allocation9], %s226_s5 }
  0x1c   : > { %s258_s9 = sshll.u32 %s251_s6, 4  ;;  %p2314_p1 = pneg %p2609_p0  ;;  %s259_s9 = int_to_ptr.vmem [resolvable:$true] %s258_s9 }
  0x1d   : > { %s2325_s12 = scalar_lea.vmem %s238_s13, 256  ;;  %s2480_s25 = smov [#allocation8]  }
  0x1e   : > { %s2603_s11 = scalar_lea.hbm %s3057_s1, %s1946_s8  ;;  %p2326_p3 = scmp.ne.s32.totalorder %s238_s13, %s2325_s12 }
  0x1f   : > { %s2330_s1 = sshll.u32 %s2480_s25, 4  ;;  %s2331_s1 = int_to_ptr.vmem [resolvable:$false] %s2330_s1 }
  0x20   : > { %p2328_p4 = pnand %p2326_p3, %p2314_p1  ;;  %s2332_s22 = scalar_lea.vmem %s2331_s1, 512 }
  0x21   : > { %p2333_p7 = scmp.lt.s32.totalorder %s238_s13, %s2331_s1  ;;  %p2334_p10 = scmp.lt.s32.totalorder %s2332_s22, %s2325_s12 }
  0x22   : > { %p2329_p6 = pneg %p2328_p4 }
  0x23   : > { %p2335_p12 = por %p2334_p10, %p2333_p7 }
  0x25   : > { %p2336_p5 = pnand %p2335_p12, %p2329_p6 }
  0x27   : > { %2339 = shalt.err (!%p2336_p5)
}
  0x28   : > { %s2481_s7 = smov 64   ;;  %s2482_s5 = smov 4  }
  0x29   : > { %2168 = dma.hbm_to_vmem [thread:$0]  (!%p2609_p0), %s2603_s11, 256, %s238_s13, %s2618_s10, %s2481_s7, %s2481_s7, %s2482_s5  }
  0x2a   : > { %p1893_p3 = scmp.ge.s32.totalorder %s2478_s20, 1  ;;  %p272_p4 = scmp.lt.s32.totalorder %s2478_s20, 3 }
  0x2b   : > { %s2483_s8 = smov [#allocation5]   ;;  %p2644_p5 = pnand %p2176_p13, %p84_p2 }
  0x2c   : > { %p2634_p12 = pnand %p1893_p3, %p272_p4  ;;  %s216_s24 = sshll.u32 %s2483_s8, 4  ;;  %s2638_s24 = int_to_ptr.vmem [resolvable:$true] %s216_s24 }
  0x2d   : > { %s2353_s12 = scalar_lea.vmem %s259_s9, 256  ;;  %s2484_s11 = smov [#allocation10]  }
  0x2e   : > { %p2354_p6 = scmp.ne.s32.totalorder %s259_s9, %s2353_s12  ;;  %s2358_s13 = sshll.u32 %s2484_s11, 4  ;;  %s2359_s13 = int_to_ptr.vmem [resolvable:$false] %s2358_s13 }
  0x2f   : > { %s2360_s25 = scalar_lea.vmem %s2359_s13, 512  ;;  %p2361_p3 = scmp.lt.s32.totalorder %s259_s9, %s2359_s13 }
  0x30   : > { %p2356_p7 = pnand %p2354_p6, %p2314_p1  ;;  %p2362_p4 = scmp.lt.s32.totalorder %s2360_s25, %s2353_s12 }
  0x32   : > { %p2357_p10 = pneg %p2356_p7  ;;  %p2363_p11 = por %p2362_p4, %p2361_p3 }
  0x34   : > { %p2364_p9 = pnand %p2363_p11, %p2357_p10 }
  0x36   : > { %2367 = shalt.err (!%p2364_p9)
}
  0x37   : > { %2171 = dma.hbm_to_vmem [thread:$0]  (!%p2609_p0), %s2616_s26, 256, %s259_s9, %s2618_s10, %s2481_s7, %s2481_s7, %s2482_s5  }
  0x38   : > { %p2370_p2 = pneg %p2644_p5  ;;  %s2379_s22 = scalar_lea.vmem %s2638_s24, 128 }
  0x39   : > { %p2380_p13 = scmp.ne.s32.totalorder %s2638_s24, %s2379_s22  ;;  %s2386_s8 = scalar_lea.vmem %s2638_s24, 256 }
  0x3a   : > { %p2387_p9 = scmp.lt.s32.totalorder %s2638_s24, %s2638_s24  ;;  %p2388_p6 = scmp.lt.s32.totalorder %s2386_s8, %s2379_s22 }
  0x3b   : > { %p2382_p1 = pnand %p2380_p13, %p2370_p2 }
  0x3c   : > { %p2389_p7 = por %p2388_p6, %p2387_p9 }
  0x3d   : > { %p2383_p11 = pneg %p2382_p1 }
  0x3f   : > { %p2390_p10 = pnand %p2389_p7, %p2383_p11 }
  0x41   : > { %2393 = shalt.err (!%p2390_p10)
}
  0x42   : > { %2165 = dma.hbm_to_vmem [thread:$0]  (!%p2644_p5), %s3045_s0, 128, %s2638_s24, [#allocation6], %s2481_s7, %s2481_s7, %s2482_s5  }
  0x43   : > { %276 = sbr.rel (%p2634_p12) target bundleno = 11406 (0x2c8e), region = 36  ;;  %p3061_p0 = scmp.eq.s32.totalorder (!%p2634_p12), %s2556_s21, 0 }
  0x48   : > { %2445 = dma.done.wait (%p3061_p0), [#allocation6], 128   ;;  %p3062_p3 = pmov %p3061_p0 }
  0x49   : > { %s287_s9 = sand.u32 1, %s2556_s21   ;;  %s2682_s10 = sand.u32 1, %s2462_s16  }
  0x4a   : > { %2447 = vsyncadd (%p3062_p3), [#allocation6], 4294967168  ;;  %s1895_s6 = sshll.u32 %s2682_s10, 4  ;;  %s288_s12 = scalar_lea.sflag [#allocation9], %s287_s9 }
  0x4b   : > { %s291_s11 = scalar_lea.vmem [#allocation8], %s1895_s6 }
  0x4c   : > { %2449 = dma.done.wait (%p2580_p8), %s288_s12, 512  }
  0x4d   : > { %2451 = vsyncadd (%p2580_p8), %s288_s12, 4294966784  ;;  %s1897_s7 = sshll.u32 %s2682_s10, 3  ;;  %vm356_vm0 = vcmask 254976   ;;  %v2485_v0 = vmov 0.0   ;;  %vm2486_vm1 = vmmov 0   ;;  %s300_s21 = scalar_lea.vmem [#allocation10], %s1895_s6 }
  0x4e   : > { %357 = vst.msk [vmem:[#allocation2] sm:$0x3] %vm356_vm0, %v2485_v0  ;;  %358 = vst.msk [vmem:[#allocation3] sm:$0x3] %vm356_vm0, %v2485_v0  ;;  %2016 = vmatprep.subr.bf16.mxu0 %v2485_v0  ;;  %2020 = vmatprep.mubr.msk.bf16.mxu0 %vm2486_vm1, %v2485_v0  ;;  %v2692_v1 = vld [vmem:[%s300_s21] sm:$0xf] }
  0x4f   : > { %v2694_v2 = vld [vmem:[%s300_s21 + $0x4] sm:$0xf]  ;;  %v2696_v3 = vld [vmem:[%s300_s21 + $0x8] sm:$0xf]  ;;  %v2698_v4 = vld [vmem:[%s300_s21 + $0xc] sm:$0xf] }
  0x50   : > { %v2245_v5 = vld [vmem:[%s291_s11 + $0x8] sm:$0xff]   ;;  %v2246_v6 = vld [vmem:[%s291_s11] sm:$0xff]   ;;  %vm389_vm2 = vcmask 261120   ;;  %p343_p8 = scmp.lt.s32.totalorder %s2470_s18, 1  ;;  %s2708_s13 = scalar_lea.vmem [#allocation11], %s1897_s7 }
  0x51   : > { %2017 = vmatpush3.bf16.msra.mxu0 %v2245_v5  ;;  %v2247_v7 = vld [vmem:[#allocation5] sm:$0xff]   ;;  %p1903_p12 = scmp.ne.s32.totalorder %s2470_s18, 0 }
  0x52   : > { %2018 = vmatprep.subr.bf16.mxu0 %v2485_v0  ;;  %s344_s27 = scalar_select %p343_p8, %s2470_s18, 1 }
  0x53   : > { %s2489_s25 = smov (!%p1903_p12), 64   ;;  %s2490_s22 = smov (!%p1903_p12), 32  }
  0x54   : > { %s345_s24 = scalar_lea.vmem %s3048_s3, %s344_s27  ;;  %s2491_s8 = smov (!%p1903_p12), 96  }
  0x55   : > { %2019 = vmatpush3.bf16.msra.mxu0 %v2246_v6  ;;  %v1898_v8 = vld [vmem:[%s345_s24] ss:$0 sm:$0xff] }
  0x58   : > { %2021 = vmatmul.mubr.msk.bf16.vlgmr.msra.gmra.mxu0 %vm389_vm2, %v2247_v7 }
 0x118   : > { %v427_v9 = vpop.f32.mrf.mxu0 }
 0x119   : > { %v428_v10 = vadd.f32 %v1898_v8, %v427_v9 }
 0x11a   : > { %v2022_v11 = vpop.f32.mrf.mxu0 }
 0x11b   : > { %434 = vst [vmem:[#allocation4] sm:$0xff] %v428_v10  ;;  %443 = sbr.rel (%p1903_p12) target bundleno = 5832 (0x16c8), region = 56 }
 0x11c   : > { %v430_v12 = vpop.f32.mrf.mxu0 }
 0x11d   : > { %v431_v13 = vadd.f32 %v1898_v8, %v430_v12 }
 0x11e   : > { %v2023_v14 = vpop.f32.mrf.mxu0 }
 0x11f   : > { %435 = vst [vmem:[#allocation4 + $0x8] sm:$0xff] %v431_v13 }
 0x120   : > { %v2713_v15 = vcombine.low %v2696_v3, %v2698_v4  ;;  %v2487_v16 = vmov 0.0   ;;  %vm2488_vm3 = vmmov 0   ;;  %v2721_v17 = vcombine.low %v2692_v1, %v2694_v2  ;;  %v444_v18 = vld [vmem:[#allocation2] sm:$0x3]  ;;  %v445_v27 = vld [vmem:[#allocation3] sm:$0x3] }
 0x121   : > { %2024 = vmatprep.subr.bf16.mxu0 %v2487_v16  ;;  %2028 = vmatprep.mubr.msk.bf16.mxu0 %vm2488_vm3, %v2487_v16  ;;  %v447_v19 = vpack.c.bf16 %v444_v18, %v444_v18  ;;  %vm535_vm4 = vcmask 253952   ;;  %vm689_vm5 = vcmask 256002   ;;  %vm612_vm6 = vcmask 254977  }
 0x122   : > { %2025 = vmatpush3.bf16.msra.mxu0 %v2713_v15  ;;  %2032 = vmatprep.subr.bf16.mxu1 %v2487_v16  ;;  %v446_v20 = vld [vmem:[#allocation4] sm:$0x3]  ;;  %v537_v41 = vld [vmem:[#allocation4 + $0x2] sm:$0x3]  ;;  %v614_v60 = vld [vmem:[#allocation4 + $0x4] sm:$0x3] }
 0x123   : > { %2026 = vmatprep.subr.bf16.mxu0 %v2487_v16  ;;  %2033 = vmatpush3.bf16.msra.mxu1 %v2713_v15  ;;  %vm766_vm7 = vcmask 257027  }
 0x124   : > { %2034 = vmatprep.subr.bf16.mxu1 %v2487_v16  ;;  %2036 = vmatprep.mubr.msk.bf16.mxu1 %vm2488_vm3, %v2487_v16 }
 0x126   : > { %2027 = vmatpush3.bf16.msra.mxu0 %v2721_v17 }
 0x127   : > { %2035 = vmatpush3.bf16.msra.mxu1 %v2721_v17  ;;  %2040 = vmatprep.subr.bf16.mxu0 %v2487_v16 }
 0x128   : > { %2048 = vmatprep.subr.bf16.mxu1 %v2487_v16 }
 0x129   : > { %2029 = vmatmul.mubr.msk.bf16.vlgmr.msra.gmra.mxu0 %vm389_vm2, %v447_v19 }
 0x12a   : > { %2041 = vmatpush3.bf16.msra.mxu0 %v2713_v15  ;;  %2044 = vmatprep.mubr.msk.bf16.mxu0 %vm2488_vm3, %v2487_v16 }
 0x12b   : > { %2042 = vmatprep.subr.bf16.mxu0 %v2487_v16 }
 0x12e   : > { %2043 = vmatpush3.bf16.msra.mxu0 %v2721_v17 }
 0x12f   : > { %2056 = vmatprep.subr.bf16.mxu0 %v2487_v16 }
 0x1e9   : > { %v497_v21 = vpop.f32.mrf.mxu0 }
 0x1ea   : > { %v503_v22 = vadd.f32 %v497_v21, %v446_v20 }
 0x1eb   : > { %v2030_v23 = vpop.f32.mrf.mxu0 }
 0x1ec   : > { %2248 = vtanh.f32 %v503_v22  ;;  %v691_v22 = vld [vmem:[#allocation4 + $0x6] sm:$0x3] }
 0x1ed   : > { %v500_v24 = vpop.f32.mrf.mxu0 }
 0x1ef   : > { %v2031_v25 = vpop.f32.mrf.mxu0 }
 0x1f9   : > { %v2249_v26 = vpop.eup %2248 }
 0x1fa   : > { %513 = vrot.lane.b32.xlu0 %v2249_v26, %s2489_s25  ;;  %v505_v28 = vadd.f32 1.0, %v2249_v26 }
 0x1fc   : > { %v506_v29 = vmul.f32 0.5, %v505_v28 }
 0x1fe   : > { %508 = vrot.lane.b32.xlu0 %v445_v27, %s2490_s22 }
 0x26c   : > { %v514_v30 = vpop.permute.xlu0 %513 }
 0x26d   : > { %v516_v31 = vmul.f32 %v514_v30, %v506_v29 }
 0x26f   : > { %518 = vrot.lane.b32.xlu1 %v516_v31, %s2490_s22 }
 0x270   : > { %v509_v32 = vpop.permute.xlu0 %508 }
 0x271   : > { %v511_v33 = vmul.f32 %v509_v32, %v506_v29 }
 0x2e1   : > { %v519_v34 = vpop.permute.xlu1 %518 }
 0x2e2   : > { %v521_v35 = vadd.f32 %v519_v34, %v511_v33 }
 0x2e4   : > { %2250 = vtanh.f32 %v521_v35 }
 0x2f1   : > { %v2251_v36 = vpop.eup %2250 }
 0x2f2   : > { %524 = vrot.lane.b32.xlu1 %v2251_v36, %s2489_s25 }
 0x364   : > { %v525_v37 = vpop.permute.xlu1 %524 }
 0x365   : > { %v527_v38 = vmul.f32 %v525_v37, %v506_v29 }
 0x367   : > { %v2744_v39 = vpack.c.bf16 %v527_v38, %v527_v38 }
 0x369   : > { %538 = vrot.lane.b32.xlu0 %v2744_v39, %s2490_s22 }
 0x3db   : > { %v539_v40 = vpop.permute.xlu0 %538 }
 0x3dc   : > { %2037 = vmatmul.mubr.msk.bf16.vlgmr.msra.gmra.mxu1 %vm389_vm2, %v539_v40 }
 0x3dd   : > { %2049 = vmatpush3.bf16.msra.mxu1 %v2713_v15  ;;  %2052 = vmatprep.mubr.msk.bf16.mxu1 %vm2488_vm3, %v2487_v16 }
 0x3de   : > { %2050 = vmatprep.subr.bf16.mxu1 %v2487_v16 }
 0x3e1   : > { %2051 = vmatpush3.bf16.msra.mxu1 %v2721_v17 }
 0x3e2   : > { %2064 = vmatprep.subr.bf16.mxu1 %v2487_v16 }
 0x49c   : > { %v577_v42 = vpop.f32.mrf.mxu1 }
 0x49d   : > { %v583_v43 = vadd.f32 %v577_v42, %v537_v41  ;;  %v768_v42 = vld [vmem:[#allocation4 + $0x8] sm:$0x3] }
 0x49e   : > { %v2038_v44 = vpop.f32.mrf.mxu1 }
 0x49f   : > { %2252 = vtanh.f32 %v583_v43 }
 0x4a0   : > { %v580_v45 = vpop.f32.mrf.mxu1 }
 0x4a2   : > { %v2039_v46 = vpop.f32.mrf.mxu1 }
 0x4ac   : > { %v2253_v47 = vpop.eup %2252 }
 0x4ad   : > { %589 = vrot.lane.b32.xlu1 %v2253_v47, %s2489_s25  ;;  %v585_v48 = vadd.f32 1.0, %v2253_v47 }
 0x4af   : > { %v586_v49 = vmul.f32 0.5, %v585_v48 }
 0x4b1   : > { %v587_v52 = vmul.f32 %v586_v49, %v521_v35 }
 0x51f   : > { %v590_v50 = vpop.permute.xlu1 %589 }
 0x520   : > { %v592_v51 = vmul.f32 %v590_v50, %v586_v49 }
 0x522   : > { %594 = vrot.lane.b32.xlu0 %v592_v51, %s2490_s22 }
 0x594   : > { %v595_v53 = vpop.permute.xlu0 %594 }
 0x595   : > { %v597_v54 = vadd.f32 %v595_v53, %v587_v52 }
 0x597   : > { %2254 = vtanh.f32 %v597_v54 }
 0x5a4   : > { %v2255_v55 = vpop.eup %2254 }
 0x5a5   : > { %600 = vrot.lane.b32.xlu1 %v2255_v55, %s2489_s25 }
 0x617   : > { %v601_v56 = vpop.permute.xlu1 %600 }
 0x618   : > { %v603_v57 = vmul.f32 %v601_v56, %v586_v49 }
 0x61a   : > { %v2758_v58 = vpack.c.bf16 %v603_v57, %v603_v57 }
 0x61c   : > { %615 = vrot.lane.b32.xlu0 %v2758_v58, %s2490_s22 }
 0x68e   : > { %v616_v59 = vpop.permute.xlu0 %615 }
 0x68f   : > { %2045 = vmatmul.mubr.msk.bf16.vlgmr.msra.gmra.mxu0 %vm389_vm2, %v616_v59 }
 0x690   : > { %2057 = vmatpush3.bf16.msra.mxu0 %v2713_v15  ;;  %2060 = vmatprep.mubr.msk.bf16.mxu0 %vm2488_vm3, %v2487_v16 }
 0x691   : > { %2058 = vmatprep.subr.bf16.mxu0 %v2487_v16 }
 0x694   : > { %2059 = vmatpush3.bf16.msra.mxu0 %v2721_v17 }
 0x695   : > { %2072 = vmatprep.subr.bf16.mxu0 %v2487_v16 }
 0x74f   : > { %v654_v61 = vpop.f32.mrf.mxu0 }
 0x750   : > { %v660_v62 = vadd.f32 %v654_v61, %v614_v60 }
 0x751   : > { %v2046_v63 = vpop.f32.mrf.mxu0 }
 0x752   : > { %2256 = vtanh.f32 %v660_v62  ;;  %v843_v62 = vld [vmem:[#allocation4 + $0xa] sm:$0x3] }
 0x753   : > { %v657_v0 = vpop.f32.mrf.mxu0 }
 0x755   : > { %v2047_v5 = vpop.f32.mrf.mxu0 }
 0x75f   : > { %v2257_v6 = vpop.eup %2256 }
 0x760   : > { %666 = vrot.lane.b32.xlu1 %v2257_v6, %s2489_s25  ;;  %v662_v7 = vadd.f32 1.0, %v2257_v6 }
 0x762   : > { %v663_v8 = vmul.f32 0.5, %v662_v7 }
 0x764   : > { %v664_v11 = vmul.f32 %v663_v8, %v597_v54 }
 0x7d2   : > { %v667_v9 = vpop.permute.xlu1 %666 }
 0x7d3   : > { %v669_v10 = vmul.f32 %v667_v9, %v663_v8 }
 0x7d5   : > { %671 = vrot.lane.b32.xlu0 %v669_v10, %s2490_s22 }
 0x847   : > { %v672_v12 = vpop.permute.xlu0 %671 }
 0x848   : > { %v674_v13 = vadd.f32 %v672_v12, %v664_v11 }
 0x84a   : > { %2258 = vtanh.f32 %v674_v13 }
 0x857   : > { %v2259_v14 = vpop.eup %2258 }
 0x858   : > { %677 = vrot.lane.b32.xlu1 %v2259_v14, %s2489_s25 }
 0x8ca   : > { %v678_v18 = vpop.permute.xlu1 %677 }
 0x8cb   : > { %v680_v19 = vmul.f32 %v678_v18, %v663_v8 }
 0x8cd   : > { %v2772_v20 = vpack.c.bf16 %v680_v19, %v680_v19 }
 0x8cf   : > { %692 = vrot.lane.b32.xlu0 %v2772_v20, %s2490_s22 }
 0x941   : > { %v693_v21 = vpop.permute.xlu0 %692 }
 0x942   : > { %2053 = vmatmul.mubr.msk.bf16.vlgmr.msra.gmra.mxu1 %vm389_vm2, %v693_v21 }
 0x943   : > { %2065 = vmatpush3.bf16.msra.mxu1 %v2713_v15  ;;  %2068 = vmatprep.mubr.msk.bf16.mxu1 %vm2488_vm3, %v2487_v16 }
 0x944   : > { %2066 = vmatprep.subr.bf16.mxu1 %v2487_v16 }
 0x947   : > { %2067 = vmatpush3.bf16.msra.mxu1 %v2721_v17 }
 0x948   : > { %2080 = vmatprep.subr.bf16.mxu1 %v2487_v16 }
 0xa02   : > { %v731_v23 = vpop.f32.mrf.mxu1 }
 0xa03   : > { %v737_v24 = vadd.f32 %v731_v23, %v691_v22  ;;  %v919_v22 = vld [vmem:[#allocation4 + $0xc] sm:$0x3] }
 0xa04   : > { %v2054_v25 = vpop.f32.mrf.mxu1 }
 0xa05   : > { %2260 = vtanh.f32 %v737_v24 }
 0xa06   : > { %v734_v26 = vpop.f32.mrf.mxu1 }
 0xa08   : > { %v2055_v27 = vpop.f32.mrf.mxu1 }
 0xa12   : > { %v2261_v28 = vpop.eup %2260 }
 0xa13   : > { %743 = vrot.lane.b32.xlu1 %v2261_v28, %s2489_s25  ;;  %v739_v29 = vadd.f32 1.0, %v2261_v28 }
 0xa15   : > { %v740_v30 = vmul.f32 0.5, %v739_v29 }
 0xa17   : > { %v741_v33 = vmul.f32 %v740_v30, %v674_v13 }
 0xa85   : > { %v744_v31 = vpop.permute.xlu1 %743 }
 0xa86   : > { %v746_v32 = vmul.f32 %v744_v31, %v740_v30 }
 0xa88   : > { %748 = vrot.lane.b32.xlu0 %v746_v32, %s2490_s22 }
 0xafa   : > { %v749_v34 = vpop.permute.xlu0 %748 }
 0xafb   : > { %v751_v35 = vadd.f32 %v749_v34, %v741_v33 }
 0xafd   : > { %2262 = vtanh.f32 %v751_v35 }
 0xb0a   : > { %v2263_v36 = vpop.eup %2262 }
 0xb0b   : > { %754 = vrot.lane.b32.xlu1 %v2263_v36, %s2489_s25 }
 0xb7d   : > { %v755_v37 = vpop.permute.xlu1 %754 }
 0xb7e   : > { %v757_v38 = vmul.f32 %v755_v37, %v740_v30 }
 0xb80   : > { %v2786_v40 = vpack.c.bf16 %v757_v38, %v757_v38 }
 0xb82   : > { %769 = vrot.lane.b32.xlu0 %v2786_v40, %s2490_s22 }
 0xbf4   : > { %v770_v41 = vpop.permute.xlu0 %769 }
 0xbf5   : > { %2061 = vmatmul.mubr.msk.bf16.vlgmr.msra.gmra.mxu0 %vm389_vm2, %v770_v41 }
 0xbf6   : > { %2073 = vmatpush3.bf16.msra.mxu0 %v2713_v15  ;;  %2076 = vmatprep.mubr.msk.bf16.mxu0 %vm2488_vm3, %v2487_v16 }
 0xbf7   : > { %2074 = vmatprep.subr.bf16.mxu0 %v2487_v16 }
 0xbfa   : > { %2075 = vmatpush3.bf16.msra.mxu0 %v2721_v17 }
 0xcb5   : > { %v808_v43 = vpop.f32.mrf.mxu0 }
 0xcb6   : > { %v814_v44 = vadd.f32 %v808_v43, %v768_v42  ;;  %v995_v43 = vld [vmem:[#allocation4 + $0xe] sm:$0x3] }
 0xcb7   : > { %v2062_v45 = vpop.f32.mrf.mxu0 }
 0xcb8   : > { %2264 = vtanh.f32 %v814_v44 }
 0xcb9   : > { %v811_v46 = vpop.f32.mrf.mxu0 }
 0xcbb   : > { %v2063_v47 = vpop.f32.mrf.mxu0 }
 0xcc5   : > { %v2265_v48 = vpop.eup %2264 }
 0xcc6   : > { %820 = vrot.lane.b32.xlu1 %v2265_v48, %s2489_s25  ;;  %v816_v49 = vadd.f32 1.0, %v2265_v48 }
 0xcc8   : > { %v817_v50 = vmul.f32 0.5, %v816_v49 }
 0xcca   : > { %v818_v53 = vmul.f32 %v817_v50, %v751_v35 }
 0xd38   : > { %v821_v51 = vpop.permute.xlu1 %820 }
 0xd39   : > { %v823_v52 = vmul.f32 %v821_v51, %v817_v50 }
 0xd3b   : > { %825 = vrot.lane.b32.xlu0 %v823_v52, %s2490_s22 }
 0xdad   : > { %v826_v54 = vpop.permute.xlu0 %825 }
 0xdae   : > { %v828_v55 = vadd.f32 %v826_v54, %v818_v53  ;;  %v685_v54 = vrot.slane %v2772_v20, 6 }
 0xdb0   : > { %2266 = vtanh.f32 %v828_v55 }
 0xdbd   : > { %v2267_v56 = vpop.eup %2266 }
 0xdbe   : > { %831 = vrot.lane.b32.xlu1 %v2267_v56, %s2489_s25 }
 0xe30   : > { %v832_v57 = vpop.permute.xlu1 %831 }
 0xe31   : > { %v834_v59 = vmul.f32 %v832_v57, %v817_v50 }
 0xe33   : > { %v2799_v60 = vpack.c.bf16 %v834_v59, %v834_v59 }
 0xe35   : > { %844 = vrot.lane.b32.xlu0 %v2799_v60, %s2490_s22 }
 0xea7   : > { %v845_v61 = vpop.permute.xlu0 %844 }
 0xea8   : > { %2069 = vmatmul.mubr.msk.bf16.vlgmr.msra.gmra.mxu1 %vm389_vm2, %v845_v61 }
 0xea9   : > { %2081 = vmatpush3.bf16.msra.mxu1 %v2713_v15  ;;  %2084 = vmatprep.mubr.msk.bf16.mxu1 %vm2488_vm3, %v2487_v16 }
 0xeaa   : > { %2082 = vmatprep.subr.bf16.mxu1 %v2487_v16 }
 0xead   : > { %2083 = vmatpush3.bf16.msra.mxu1 %v2721_v17 }
 0xf68   : > { %v883_v63 = vpop.f32.mrf.mxu1 }
 0xf69   : > { %v889_v0 = vadd.f32 %v883_v63, %v843_v62 }
 0xf6a   : > { %v2070_v5 = vpop.f32.mrf.mxu1 }
 0xf6b   : > { %2268 = vtanh.f32 %v889_v0  ;;  %v762_v0 = vrot.slane %v2786_v40, 5 }
 0xf6c   : > { %v886_v6 = vpop.f32.mrf.mxu1 }
 0xf6e   : > { %v2071_v7 = vpop.f32.mrf.mxu1 }
 0xf78   : > { %v2269_v8 = vpop.eup %2268 }
 0xf79   : > { %895 = vrot.lane.b32.xlu1 %v2269_v8, %s2489_s25  ;;  %v891_v9 = vadd.f32 1.0, %v2269_v8 }
 0xf7b   : > { %v892_v10 = vmul.f32 0.5, %v891_v9 }
 0xf7d   : > { %v893_v12 = vmul.f32 %v892_v10, %v828_v55 }
 0xfeb   : > { %v896_v15 = vpop.permute.xlu1 %895 }
 0xfec   : > { %v898_v11 = vmul.f32 %v896_v15, %v892_v10 }
 0xfee   : > { %900 = vrot.lane.b32.xlu0 %v898_v11, %s2490_s22 }
0x1060   : > { %v901_v16 = vpop.permute.xlu0 %900 }
0x1061   : > { %v903_v13 = vadd.f32 %v901_v16, %v893_v12 }
0x1063   : > { %2270 = vtanh.f32 %v903_v13 }
0x1070   : > { %v2271_v17 = vpop.eup %2270 }
0x1071   : > { %906 = vrot.lane.b32.xlu1 %v2271_v17, %s2489_s25 }
0x10e3   : > { %v907_v14 = vpop.permute.xlu1 %906 }
0x10e4   : > { %v909_v18 = vmul.f32 %v907_v14, %v892_v10 }
0x10e6   : > { %v2812_v19 = vpack.c.bf16 %v909_v18, %v909_v18 }
0x10e8   : > { %920 = vrot.lane.b32.xlu0 %v2812_v19, %s2490_s22  ;;  %v914_v5 = vrot.slane %v2812_v19, 7 }
0x115a   : > { %v921_v21 = vpop.permute.xlu0 %920 }
0x115b   : > { %2077 = vmatmul.mubr.msk.bf16.vlgmr.msra.gmra.mxu0 %vm389_vm2, %v921_v21 }
0x121b   : > { %v959_v23 = vpop.f32.mrf.mxu0 }
0x121c   : > { %v965_v24 = vadd.f32 %v959_v23, %v919_v22 }
0x121d   : > { %v2078_v25 = vpop.f32.mrf.mxu0 }
0x121e   : > { %2272 = vtanh.f32 %v965_v24 }
0x121f   : > { %v962_v26 = vpop.f32.mrf.mxu0 }
0x1221   : > { %v2079_v27 = vpop.f32.mrf.mxu0 }
0x122b   : > { %v2273_v28 = vpop.eup %2272 }
0x122c   : > { %971 = vrot.lane.b32.xlu1 %v2273_v28, %s2489_s25  ;;  %v967_v29 = vadd.f32 1.0, %v2273_v28 }
0x122e   : > { %v968_v30 = vmul.f32 0.5, %v967_v29 }
0x1230   : > { %v969_v33 = vmul.f32 %v968_v30, %v903_v13 }
0x129e   : > { %v972_v31 = vpop.permute.xlu1 %971 }
0x129f   : > { %v974_v32 = vmul.f32 %v972_v31, %v968_v30 }
0x12a1   : > { %976 = vrot.lane.b32.xlu0 %v974_v32, %s2490_s22 }
0x1313   : > { %v977_v34 = vpop.permute.xlu0 %976 }
0x1314   : > { %v979_v35 = vadd.f32 %v977_v34, %v969_v33 }
0x1316   : > { %2274 = vtanh.f32 %v979_v35 }
0x1323   : > { %v2275_v36 = vpop.eup %2274 }
0x1324   : > { %982 = vrot.lane.b32.xlu1 %v2275_v36, %s2489_s25 }
0x1396   : > { %v983_v37 = vpop.permute.xlu1 %982 }
0x1397   : > { %v985_v38 = vmul.f32 %v983_v37, %v968_v30 }
0x1399   : > { %v986_v41 = vpack.c.bf16 %v985_v38, %v985_v38 }
0x139b   : > { %996 = vrot.lane.b32.xlu0 %v986_v41, %s2490_s22  ;;  %v990_v55 = vrot.slane %v986_v41, 6 }
0x140d   : > { %v997_v42 = vpop.permute.xlu0 %996 }
0x140e   : > { %2085 = vmatmul.mubr.msk.bf16.vlgmr.msra.gmra.mxu1 %vm389_vm2, %v997_v42 }
0x14ce   : > { %v1035_v44 = vpop.f32.mrf.mxu1 }
0x14cf   : > { %v1041_v45 = vadd.f32 %v1035_v44, %v995_v43 }
0x14d0   : > { %v2086_v46 = vpop.f32.mrf.mxu1 }
0x14d1   : > { %2276 = vtanh.f32 %v1041_v45 }
0x14d2   : > { %v1038_v47 = vpop.f32.mrf.mxu1 }
0x14d4   : > { %v2087_v48 = vpop.f32.mrf.mxu1 }
0x14de   : > { %v2277_v49 = vpop.eup %2276 }
0x14df   : > { %1047 = vrot.lane.b32.xlu1 %v2277_v49, %s2489_s25  ;;  %v1043_v50 = vadd.f32 1.0, %v2277_v49 }
0x14e1   : > { %v1044_v51 = vmul.f32 0.5, %v1043_v50 }
0x14e3   : > { %v1045_v56 = vmul.f32 %v1044_v51, %v979_v35 }
0x1551   : > { %v1048_v52 = vpop.permute.xlu1 %1047 }
0x1552   : > { %v1050_v53 = vmul.f32 %v1048_v52, %v1044_v51 }
0x1554   : > { %1052 = vrot.lane.b32.xlu0 %v1050_v53, %s2490_s22 }
0x1558   : > { %532 = vrot.lane.b32.xlu0 %v2744_v39, %s2490_s22 }
0x155c   : > { %686 = vrot.lane.b32.xlu0 %v685_v54, %s2490_s22 }
0x1560   : > { %839 = vrot.lane.b32.xlu0 %v2799_v60, %s2490_s22  ;;  %v608_v60 = vrot.slane %v2758_v58, 7 }
0x1564   : > { %991 = vrot.lane.b32.xlu0 %v990_v55, %s2490_s22 }
0x15c6   : > { %v1053_v57 = vpop.permute.xlu0 %1052 }
0x15c7   : > { %v1055_v59 = vadd.f32 %v1053_v57, %v1045_v56 }
0x15c9   : > { %2278 = vtanh.f32 %v1055_v59 }
0x15ca   : > { %v533_v61 = vpop.permute.xlu0 %532 }
0x15cb   : > { %536 = vst.msk [vmem:[%s2708_s13] sm:$0x1] %vm535_vm4, %v533_v61 }
0x15ce   : > { %v687_v39 = vpop.permute.xlu0 %686 }
0x15cf   : > { %690 = vst.msk [vmem:[%s2708_s13] sm:$0x4] %vm689_vm5, %v687_v39 }
0x15d2   : > { %v840_v20 = vpop.permute.xlu0 %839 }
0x15d3   : > { %842 = vst.msk [vmem:[%s2708_s13 + $0x4] sm:$0x1] %vm535_vm4, %v840_v20 }
0x15d6   : > { %v2279_v62 = vpop.eup %2278  ;;  %v992_v63 = vpop.permute.xlu0 %991 }
0x15d7   : > { %994 = vst.msk [vmem:[%s2708_s13 + $0x4] sm:$0x4] %vm689_vm5, %v992_v63  ;;  %1058 = vrot.lane.b32.xlu1 %v2279_v62, %s2489_s25 }
0x15db   : > { %609 = vrot.lane.b32.xlu1 %v608_v60, %s2490_s22 }
0x15df   : > { %763 = vrot.lane.b32.xlu1 %v762_v0, %s2490_s22 }
0x15e3   : > { %915 = vrot.lane.b32.xlu1 %v914_v5, %s2490_s22 }
0x1649   : > { %v1059_v6 = vpop.permute.xlu1 %1058 }
0x164a   : > { %v1061_v7 = vmul.f32 %v1059_v6, %v1044_v51 }
0x164c   : > { %v1955_v8 = vpack.c.bf16 %v1061_v7, %v1061_v7  ;;  %1072 = vrot.lane.b32.xlu0 %v1061_v7, %s2490_s22 }
0x164d   : > { %v610_v58 = vpop.permute.xlu1 %609 }
0x164e   : > { %v1066_v9 = vrot.slane %v1955_v8, 5  ;;  %613 = vst.msk [vmem:[%s2708_s13] sm:$0x2] %vm612_vm6, %v610_v58 }
0x1650   : > { %1067 = vrot.lane.b32.xlu1 %v1066_v9, %s2490_s22 }
0x1651   : > { %v764_v40 = vpop.permute.xlu1 %763 }
0x1652   : > { %767 = vst.msk [vmem:[%s2708_s13] sm:$0x8] %vm766_vm7, %v764_v40 }
0x1654   : > { %1078 = vrot.lane.b32.xlu1 %v1055_v59, %s2491_s8 }
0x1655   : > { %v916_v10 = vpop.permute.xlu1 %915 }
0x1656   : > { %918 = vst.msk [vmem:[%s2708_s13 + $0x4] sm:$0x2] %vm612_vm6, %v916_v10 }
0x16be   : > { %v1073_v15 = vpop.permute.xlu0 %1072 }
0x16bf   : > { %1076 = vst.msk [vmem:[#allocation2] sm:$0x3] %vm356_vm0, %v1073_v15 }
0x16c2   : > { %v1068_v11 = vpop.permute.xlu1 %1067 }
0x16c3   : > { %1070 = vst.msk [vmem:[%s2708_s13 + $0x4] sm:$0x8] %vm766_vm7, %v1068_v11 }
0x16c6   : > { %v1079_v12 = vpop.permute.xlu1 %1078 }
0x16c7   : > { %1081 = vst.msk [vmem:[#allocation3] sm:$0x3] %vm356_vm0, %v1079_v12 }
0x16c8 PF: > { %p1922_p5 = scmp.ne.s32.totalorder %s2470_s18, 1 }
0x16c9   : > { %s2494_s14 = smov (!%p1922_p5), 64   ;;  %s2495_s26 = smov (!%p1922_p5), 32  }
0x16ca   : > { %1085 = sbr.rel (%p1922_p5) target bundleno = 11381 (0x2c75), region = 60  ;;  %s2496_s9 = smov (!%p1922_p5), 96  }
0x16cf   : > { %v2853_v16 = vcombine.low %v2696_v3, %v2698_v4  ;;  %v2492_v13 = vmov 0.0   ;;  %vm2493_vm8 = vmmov 0   ;;  %v2861_v17 = vcombine.low %v2692_v1, %v2694_v2  ;;  %v1086_v14 = vld [vmem:[#allocation2] sm:$0x3]  ;;  %v1088_v1 = vld [vmem:[#allocation4 + $0xe] sm:$0x3] }
0x16d0   : > { %2088 = vmatprep.subr.bf16.mxu0 %v2492_v13  ;;  %2092 = vmatprep.mubr.msk.bf16.mxu0 %vm2493_vm8, %v2492_v13  ;;  %v1089_v3 = vpack.c.bf16 %v1086_v14, %v1086_v14  ;;  %v1087_v23 = vld [vmem:[#allocation3] sm:$0x3]  ;;  %v1180_v37 = vld [vmem:[#allocation4 + $0xc] sm:$0x3]  ;;  %v1257_v59 = vld [vmem:[#allocation4 + $0xa] sm:$0x3] }
0x16d1   : > { %2089 = vmatpush3.bf16.msra.mxu0 %v2853_v16  ;;  %2096 = vmatprep.subr.bf16.mxu1 %v2492_v13  ;;  %v1334_v14 = vld [vmem:[#allocation4 + $0x8] sm:$0x3]  ;;  %vm1178_vm9 = vcmask 257027   ;;  %vm1332_vm10 = vcmask 254977   ;;  %vm1255_vm11 = vcmask 256002   ;;  %vm1408_vm12 = vcmask 253952  }
0x16d2   : > { %2090 = vmatprep.subr.bf16.mxu0 %v2492_v13  ;;  %2097 = vmatpush3.bf16.msra.mxu1 %v2853_v16 }
0x16d3   : > { %2098 = vmatprep.subr.bf16.mxu1 %v2492_v13  ;;  %2100 = vmatprep.mubr.msk.bf16.mxu1 %vm2493_vm8, %v2492_v13 }
0x16d5   : > { %2091 = vmatpush3.bf16.msra.mxu0 %v2861_v17 }
0x16d6   : > { %2099 = vmatpush3.bf16.msra.mxu1 %v2861_v17  ;;  %2104 = vmatprep.subr.bf16.mxu0 %v2492_v13 }
0x16d7   : > { %2112 = vmatprep.subr.bf16.mxu1 %v2492_v13 }
0x16d8   : > { %2093 = vmatmul.mubr.msk.bf16.vlgmr.msra.gmra.mxu0 %vm389_vm2, %v1089_v3 }
0x16d9   : > { %2105 = vmatpush3.bf16.msra.mxu0 %v2853_v16  ;;  %2108 = vmatprep.mubr.msk.bf16.mxu0 %vm2493_vm8, %v2492_v13 }
0x16da   : > { %2106 = vmatprep.subr.bf16.mxu0 %v2492_v13 }
0x16dd   : > { %2107 = vmatpush3.bf16.msra.mxu0 %v2861_v17 }
0x16de   : > { %2120 = vmatprep.subr.bf16.mxu0 %v2492_v13 }
0x1798   : > { %v1139_v2 = vpop.f32.mrf.mxu0 }
0x1799   : > { %v1145_v4 = vadd.f32 %v1139_v2, %v1088_v1 }
0x179a   : > { %v2094_v18 = vpop.f32.mrf.mxu0 }
0x179b   : > { %2280 = vtanh.f32 %v1145_v4 }
0x179c   : > { %v1142_v19 = vpop.f32.mrf.mxu0 }
0x179e   : > { %v2095_v21 = vpop.f32.mrf.mxu0 }
0x17a8   : > { %v2281_v22 = vpop.eup %2280 }
0x17a9   : > { %1155 = vrot.lane.b32.xlu0 %v2281_v22, %s2494_s14  ;;  %v1147_v24 = vadd.f32 1.0, %v2281_v22 }
0x17ab   : > { %v1148_v25 = vmul.f32 0.5, %v1147_v24 }
0x17ad   : > { %1150 = vrot.lane.b32.xlu0 %v1087_v23, %s2495_s26 }
0x181b   : > { %v1156_v26 = vpop.permute.xlu0 %1155 }
0x181c   : > { %v1158_v27 = vmul.f32 %v1156_v26, %v1148_v25 }
0x181e   : > { %1160 = vrot.lane.b32.xlu1 %v1158_v27, %s2495_s26 }
0x181f   : > { %v1151_v28 = vpop.permute.xlu0 %1150 }
0x1820   : > { %v1153_v29 = vmul.f32 %v1151_v28, %v1148_v25 }
0x1890   : > { %v1161_v30 = vpop.permute.xlu1 %1160 }
0x1891   : > { %v1163_v31 = vadd.f32 %v1161_v30, %v1153_v29 }
0x1893   : > { %2282 = vtanh.f32 %v1163_v31 }
0x18a0   : > { %v2283_v32 = vpop.eup %2282 }
0x18a1   : > { %1166 = vrot.lane.b32.xlu1 %v2283_v32, %s2494_s14 }
0x1913   : > { %v1167_v33 = vpop.permute.xlu1 %1166 }
0x1914   : > { %v1169_v34 = vmul.f32 %v1167_v33, %v1148_v25  ;;  %v1410_v33 = vld [vmem:[#allocation4 + $0x6] sm:$0x3] }
0x1916   : > { %v2884_v35 = vpack.c.bf16 %v1169_v34, %v1169_v34 }
0x1918   : > { %1181 = vrot.lane.b32.xlu0 %v2884_v35, %s2495_s26 }
0x198a   : > { %v1182_v36 = vpop.permute.xlu0 %1181 }
0x198b   : > { %2101 = vmatmul.mubr.msk.bf16.vlgmr.msra.gmra.mxu1 %vm389_vm2, %v1182_v36 }
0x198c   : > { %2113 = vmatpush3.bf16.msra.mxu1 %v2853_v16  ;;  %2116 = vmatprep.mubr.msk.bf16.mxu1 %vm2493_vm8, %v2492_v13 }
0x198d   : > { %2114 = vmatprep.subr.bf16.mxu1 %v2492_v13 }
0x1990   : > { %2115 = vmatpush3.bf16.msra.mxu1 %v2861_v17 }
0x1991   : > { %2128 = vmatprep.subr.bf16.mxu1 %v2492_v13 }
0x1a4b   : > { %v1220_v38 = vpop.f32.mrf.mxu1 }
0x1a4c   : > { %v1226_v41 = vadd.f32 %v1220_v38, %v1180_v37 }
0x1a4d   : > { %v2102_v42 = vpop.f32.mrf.mxu1 }
0x1a4e   : > { %2284 = vtanh.f32 %v1226_v41 }
0x1a4f   : > { %v1223_v43 = vpop.f32.mrf.mxu1 }
0x1a51   : > { %v2103_v44 = vpop.f32.mrf.mxu1 }
0x1a5b   : > { %v2285_v45 = vpop.eup %2284 }
0x1a5c   : > { %1232 = vrot.lane.b32.xlu1 %v2285_v45, %s2494_s14  ;;  %v1228_v46 = vadd.f32 1.0, %v2285_v45 }
0x1a5e   : > { %v1229_v47 = vmul.f32 0.5, %v1228_v46 }
0x1a60   : > { %v1230_v50 = vmul.f32 %v1229_v47, %v1163_v31 }
0x1ace   : > { %v1233_v48 = vpop.permute.xlu1 %1232 }
0x1acf   : > { %v1235_v49 = vmul.f32 %v1233_v48, %v1229_v47 }
0x1ad1   : > { %1237 = vrot.lane.b32.xlu0 %v1235_v49, %s2495_s26 }
0x1b43   : > { %v1238_v51 = vpop.permute.xlu0 %1237 }
0x1b44   : > { %v1240_v52 = vadd.f32 %v1238_v51, %v1230_v50 }
0x1b46   : > { %2286 = vtanh.f32 %v1240_v52 }
0x1b53   : > { %v2287_v53 = vpop.eup %2286 }
0x1b54   : > { %1243 = vrot.lane.b32.xlu1 %v2287_v53, %s2494_s14 }
0x1bc6   : > { %v1244_v54 = vpop.permute.xlu1 %1243 }
0x1bc7   : > { %v1246_v55 = vmul.f32 %v1244_v54, %v1229_v47 }
0x1bc9   : > { %v2898_v56 = vpack.c.bf16 %v1246_v55, %v1246_v55  ;;  %v1486_v55 = vld [vmem:[#allocation4 + $0x4] sm:$0x3] }
0x1bcb   : > { %1258 = vrot.lane.b32.xlu0 %v2898_v56, %s2495_s26 }
0x1c3d   : > { %v1259_v57 = vpop.permute.xlu0 %1258 }
0x1c3e   : > { %2109 = vmatmul.mubr.msk.bf16.vlgmr.msra.gmra.mxu0 %vm389_vm2, %v1259_v57 }
0x1c3f   : > { %2121 = vmatpush3.bf16.msra.mxu0 %v2853_v16  ;;  %2124 = vmatprep.mubr.msk.bf16.mxu0 %vm2493_vm8, %v2492_v13 }
0x1c40   : > { %2122 = vmatprep.subr.bf16.mxu0 %v2492_v13 }
0x1c43   : > { %2123 = vmatpush3.bf16.msra.mxu0 %v2861_v17 }
0x1c44   : > { %2136 = vmatprep.subr.bf16.mxu0 %v2492_v13 }
0x1cfe   : > { %v1297_v61 = vpop.f32.mrf.mxu0 }
0x1cff   : > { %v1303_v39 = vadd.f32 %v1297_v61, %v1257_v59 }
0x1d00   : > { %v2110_v20 = vpop.f32.mrf.mxu0 }
0x1d01   : > { %2288 = vtanh.f32 %v1303_v39 }
0x1d02   : > { %v1300_v62 = vpop.f32.mrf.mxu0 }
0x1d04   : > { %v2111_v63 = vpop.f32.mrf.mxu0 }
0x1d0e   : > { %v2289_v60 = vpop.eup %2288 }
0x1d0f   : > { %1309 = vrot.lane.b32.xlu1 %v2289_v60, %s2494_s14  ;;  %v1305_v0 = vadd.f32 1.0, %v2289_v60 }
0x1d11   : > { %v1306_v5 = vmul.f32 0.5, %v1305_v0 }
0x1d13   : > { %v1307_v8 = vmul.f32 %v1306_v5, %v1240_v52 }
0x1d81   : > { %v1310_v6 = vpop.permute.xlu1 %1309 }
0x1d82   : > { %v1312_v7 = vmul.f32 %v1310_v6, %v1306_v5 }
0x1d84   : > { %1314 = vrot.lane.b32.xlu0 %v1312_v7, %s2495_s26 }
0x1df6   : > { %v1315_v58 = vpop.permute.xlu0 %1314 }
0x1df7   : > { %v1317_v9 = vadd.f32 %v1315_v58, %v1307_v8 }
0x1df9   : > { %2290 = vtanh.f32 %v1317_v9 }
0x1e06   : > { %v2291_v40 = vpop.eup %2290 }
0x1e07   : > { %1320 = vrot.lane.b32.xlu1 %v2291_v40, %s2494_s14  ;;  %v1562_v40 = vld [vmem:[#allocation4 + $0x2] sm:$0x3] }
0x1e79   : > { %v1321_v10 = vpop.permute.xlu1 %1320 }
0x1e7a   : > { %v1323_v15 = vmul.f32 %v1321_v10, %v1306_v5 }
0x1e7c   : > { %v2912_v11 = vpack.c.bf16 %v1323_v15, %v1323_v15 }
0x1e7e   : > { %1335 = vrot.lane.b32.xlu0 %v2912_v11, %s2495_s26 }
0x1ef0   : > { %v1336_v12 = vpop.permute.xlu0 %1335 }
0x1ef1   : > { %2117 = vmatmul.mubr.msk.bf16.vlgmr.msra.gmra.mxu1 %vm389_vm2, %v1336_v12 }
0x1ef2   : > { %2129 = vmatpush3.bf16.msra.mxu1 %v2853_v16  ;;  %2132 = vmatprep.mubr.msk.bf16.mxu1 %vm2493_vm8, %v2492_v13 }
0x1ef3   : > { %2130 = vmatprep.subr.bf16.mxu1 %v2492_v13 }
0x1ef6   : > { %2131 = vmatpush3.bf16.msra.mxu1 %v2861_v17 }
0x1ef7   : > { %2144 = vmatprep.subr.bf16.mxu1 %v2492_v13 }
0x1fb1   : > { %v1374_v3 = vpop.f32.mrf.mxu1 }
0x1fb2   : > { %v1380_v1 = vadd.f32 %v1374_v3, %v1334_v14 }
0x1fb3   : > { %v2118_v2 = vpop.f32.mrf.mxu1 }
0x1fb4   : > { %2292 = vtanh.f32 %v1380_v1 }
0x1fb5   : > { %v1377_v4 = vpop.f32.mrf.mxu1 }
0x1fb7   : > { %v2119_v18 = vpop.f32.mrf.mxu1 }
0x1fc1   : > { %v2293_v19 = vpop.eup %2292 }
0x1fc2   : > { %1386 = vrot.lane.b32.xlu1 %v2293_v19, %s2494_s14  ;;  %v1382_v21 = vadd.f32 1.0, %v2293_v19 }
0x1fc4   : > { %v1383_v22 = vmul.f32 0.5, %v1382_v21 }
0x1fc6   : > { %v1384_v25 = vmul.f32 %v1383_v22, %v1317_v9 }
0x2034   : > { %v1387_v23 = vpop.permute.xlu1 %1386 }
0x2035   : > { %v1389_v24 = vmul.f32 %v1387_v23, %v1383_v22 }
0x2037   : > { %1391 = vrot.lane.b32.xlu0 %v1389_v24, %s2495_s26 }
0x20a9   : > { %v1392_v26 = vpop.permute.xlu0 %1391 }
0x20aa   : > { %v1394_v27 = vadd.f32 %v1392_v26, %v1384_v25 }
0x20ac   : > { %2294 = vtanh.f32 %v1394_v27 }
0x20b9   : > { %v2295_v28 = vpop.eup %2294 }
0x20ba   : > { %1397 = vrot.lane.b32.xlu1 %v2295_v28, %s2494_s14 }
0x212c   : > { %v1398_v29 = vpop.permute.xlu1 %1397 }
0x212d   : > { %v1400_v30 = vmul.f32 %v1398_v29, %v1383_v22  ;;  %v1638_v29 = vld [vmem:[#allocation4] sm:$0x3] }
0x212f   : > { %v2926_v31 = vpack.c.bf16 %v1400_v30, %v1400_v30 }
0x2131   : > { %1411 = vrot.lane.b32.xlu0 %v2926_v31, %s2495_s26 }
0x21a3   : > { %v1412_v32 = vpop.permute.xlu0 %1411 }
0x21a4   : > { %2125 = vmatmul.mubr.msk.bf16.vlgmr.msra.gmra.mxu0 %vm389_vm2, %v1412_v32 }
0x21a5   : > { %2137 = vmatpush3.bf16.msra.mxu0 %v2853_v16  ;;  %2140 = vmatprep.mubr.msk.bf16.mxu0 %vm2493_vm8, %v2492_v13 }
0x21a6   : > { %2138 = vmatprep.subr.bf16.mxu0 %v2492_v13 }
0x21a9   : > { %2139 = vmatpush3.bf16.msra.mxu0 %v2861_v17 }
0x2264   : > { %v1450_v34 = vpop.f32.mrf.mxu0 }
0x2265   : > { %v1456_v36 = vadd.f32 %v1450_v34, %v1410_v33 }
0x2266   : > { %v2126_v37 = vpop.f32.mrf.mxu0 }
0x2267   : > { %2296 = vtanh.f32 %v1456_v36 }
0x2268   : > { %v1453_v38 = vpop.f32.mrf.mxu0 }
0x226a   : > { %v2127_v41 = vpop.f32.mrf.mxu0 }
0x2274   : > { %v2297_v42 = vpop.eup %2296 }
0x2275   : > { %1462 = vrot.lane.b32.xlu1 %v2297_v42, %s2494_s14  ;;  %v1458_v43 = vadd.f32 1.0, %v2297_v42 }
0x2277   : > { %v1459_v44 = vmul.f32 0.5, %v1458_v43 }
0x2279   : > { %v1460_v47 = vmul.f32 %v1459_v44, %v1394_v27 }
0x22e7   : > { %v1463_v45 = vpop.permute.xlu1 %1462 }
0x22e8   : > { %v1465_v46 = vmul.f32 %v1463_v45, %v1459_v44  ;;  %v1328_v45 = vrot.slane %v2912_v11, 7 }
0x22ea   : > { %1467 = vrot.lane.b32.xlu0 %v1465_v46, %s2495_s26 }
0x235c   : > { %v1468_v48 = vpop.permute.xlu0 %1467 }
0x235d   : > { %v1470_v49 = vadd.f32 %v1468_v48, %v1460_v47 }
0x235f   : > { %2298 = vtanh.f32 %v1470_v49 }
0x236c   : > { %v2299_v50 = vpop.eup %2298 }
0x236d   : > { %1473 = vrot.lane.b32.xlu1 %v2299_v50, %s2494_s14 }
0x23df   : > { %v1474_v51 = vpop.permute.xlu1 %1473 }
0x23e0   : > { %v1476_v52 = vmul.f32 %v1474_v51, %v1459_v44  ;;  %v1174_v44 = vrot.slane %v2884_v35, 5 }
0x23e2   : > { %v2939_v53 = vpack.c.bf16 %v1476_v52, %v1476_v52 }
0x23e4   : > { %1487 = vrot.lane.b32.xlu0 %v2939_v53, %s2495_s26  ;;  %v1481_v46 = vrot.slane %v2939_v53, 5 }
0x2456   : > { %v1488_v54 = vpop.permute.xlu0 %1487 }
0x2457   : > { %2133 = vmatmul.mubr.msk.bf16.vlgmr.msra.gmra.mxu1 %vm389_vm2, %v1488_v54  ;;  %v1251_v54 = vrot.slane %v2898_v56, 6 }
0x2458   : > { %2145 = vmatpush3.bf16.msra.mxu1 %v2853_v16  ;;  %2148 = vmatprep.mubr.msk.bf16.mxu1 %vm2493_vm8, %v2492_v13 }
0x2459   : > { %2146 = vmatprep.subr.bf16.mxu1 %v2492_v13 }
0x245c   : > { %2147 = vmatpush3.bf16.msra.mxu1 %v2861_v17 }
0x2517   : > { %v1526_v57 = vpop.f32.mrf.mxu1 }
0x2518   : > { %v1532_v59 = vadd.f32 %v1526_v57, %v1486_v55 }
0x2519   : > { %v2134_v61 = vpop.f32.mrf.mxu1 }
0x251a   : > { %2300 = vtanh.f32 %v1532_v59 }
0x251b   : > { %v1529_v39 = vpop.f32.mrf.mxu1 }
0x251d   : > { %v2135_v20 = vpop.f32.mrf.mxu1 }
0x2527   : > { %v2301_v62 = vpop.eup %2300 }
0x2528   : > { %1538 = vrot.lane.b32.xlu1 %v2301_v62, %s2494_s14  ;;  %v1534_v63 = vadd.f32 1.0, %v2301_v62 }
0x252a   : > { %v1535_v60 = vmul.f32 0.5, %v1534_v63 }
0x252c   : > { %v1536_v5 = vmul.f32 %v1535_v60, %v1470_v49 }
0x259a   : > { %v1539_v16 = vpop.permute.xlu1 %1538 }
0x259b   : > { %v1541_v0 = vmul.f32 %v1539_v16, %v1535_v60 }
0x259d   : > { %1543 = vrot.lane.b32.xlu0 %v1541_v0, %s2495_s26 }
0x260f   : > { %v1544_v13 = vpop.permute.xlu0 %1543 }
0x2610   : > { %v1546_v6 = vadd.f32 %v1544_v13, %v1536_v5 }
0x2612   : > { %2302 = vtanh.f32 %v1546_v6 }
0x261f   : > { %v2303_v17 = vpop.eup %2302 }
0x2620   : > { %1549 = vrot.lane.b32.xlu1 %v2303_v17, %s2494_s14 }
0x2692   : > { %v1550_v7 = vpop.permute.xlu1 %1549 }
0x2693   : > { %v1552_v8 = vmul.f32 %v1550_v7, %v1535_v60 }
0x2695   : > { %v2952_v58 = vpack.c.bf16 %v1552_v8, %v1552_v8 }
0x2697   : > { %1563 = vrot.lane.b32.xlu0 %v2952_v58, %s2495_s26  ;;  %v1557_v55 = vrot.slane %v2952_v58, 6 }
0x2709   : > { %v1564_v9 = vpop.permute.xlu0 %1563 }
0x270a   : > { %2141 = vmatmul.mubr.msk.bf16.vlgmr.msra.gmra.mxu0 %vm389_vm2, %v1564_v9 }
0x27ca   : > { %v1602_v10 = vpop.f32.mrf.mxu0 }
0x27cb   : > { %v1608_v15 = vadd.f32 %v1602_v10, %v1562_v40 }
0x27cc   : > { %v2142_v12 = vpop.f32.mrf.mxu0 }
0x27cd   : > { %2304 = vtanh.f32 %v1608_v15 }
0x27ce   : > { %v1605_v14 = vpop.f32.mrf.mxu0 }
0x27d0   : > { %v2143_v3 = vpop.f32.mrf.mxu0 }
0x27da   : > { %v2305_v1 = vpop.eup %2304 }
0x27db   : > { %1614 = vrot.lane.b32.xlu1 %v2305_v1, %s2494_s14  ;;  %v1610_v2 = vadd.f32 1.0, %v2305_v1 }
0x27dd   : > { %v1611_v4 = vmul.f32 0.5, %v1610_v2 }
0x27df   : > { %v1612_v21 = vmul.f32 %v1611_v4, %v1546_v6 }
0x284d   : > { %v1615_v18 = vpop.permute.xlu1 %1614 }
0x284e   : > { %v1617_v19 = vmul.f32 %v1615_v18, %v1611_v4 }
0x2850   : > { %1619 = vrot.lane.b32.xlu0 %v1617_v19, %s2495_s26 }
0x28c2   : > { %v1620_v22 = vpop.permute.xlu0 %1619 }
0x28c3   : > { %v1622_v23 = vadd.f32 %v1620_v22, %v1612_v21 }
0x28c5   : > { %2306 = vtanh.f32 %v1622_v23 }
0x28d2   : > { %v2307_v24 = vpop.eup %2306 }
0x28d3   : > { %1625 = vrot.lane.b32.xlu1 %v2307_v24, %s2494_s14 }
0x2945   : > { %v1626_v25 = vpop.permute.xlu1 %1625 }
0x2946   : > { %v1628_v26 = vmul.f32 %v1626_v25, %v1611_v4 }
0x2948   : > { %v1629_v27 = vpack.c.bf16 %v1628_v26, %v1628_v26 }
0x294a   : > { %1639 = vrot.lane.b32.xlu0 %v1629_v27, %s2495_s26  ;;  %v1633_v47 = vrot.slane %v1629_v27, 7 }
0x29bc   : > { %v1640_v28 = vpop.permute.xlu0 %1639 }
0x29bd   : > { %2149 = vmatmul.mubr.msk.bf16.vlgmr.msra.gmra.mxu1 %vm389_vm2, %v1640_v28 }
0x2a7d   : > { %v1678_v30 = vpop.f32.mrf.mxu1 }
0x2a7e   : > { %v1684_v32 = vadd.f32 %v1678_v30, %v1638_v29 }
0x2a7f   : > { %v2150_v33 = vpop.f32.mrf.mxu1 }
0x2a80   : > { %2308 = vtanh.f32 %v1684_v32 }
0x2a81   : > { %v1681_v34 = vpop.f32.mrf.mxu1 }
0x2a83   : > { %v2151_v36 = vpop.f32.mrf.mxu1 }
0x2a8d   : > { %v2309_v37 = vpop.eup %2308 }
0x2a8e   : > { %1690 = vrot.lane.b32.xlu1 %v2309_v37, %s2494_s14  ;;  %v1686_v38 = vadd.f32 1.0, %v2309_v37 }
0x2a90   : > { %v1687_v41 = vmul.f32 0.5, %v1686_v38 }
0x2a92   : > { %v1688_v48 = vmul.f32 %v1687_v41, %v1622_v23 }
0x2b00   : > { %v1691_v42 = vpop.permute.xlu1 %1690 }
0x2b01   : > { %v1693_v43 = vmul.f32 %v1691_v42, %v1687_v41 }
0x2b03   : > { %1695 = vrot.lane.b32.xlu0 %v1693_v43, %s2495_s26 }
0x2b07   : > { %1175 = vrot.lane.b32.xlu0 %v1174_v44, %s2495_s26 }
0x2b0b   : > { %1329 = vrot.lane.b32.xlu0 %v1328_v45, %s2495_s26 }
0x2b0f   : > { %1482 = vrot.lane.b32.xlu0 %v1481_v46, %s2495_s26 }
0x2b13   : > { %1634 = vrot.lane.b32.xlu0 %v1633_v47, %s2495_s26 }
0x2b75   : > { %v1696_v49 = vpop.permute.xlu0 %1695 }
0x2b76   : > { %v1698_v50 = vadd.f32 %v1696_v49, %v1688_v48 }
0x2b78   : > { %2310 = vtanh.f32 %v1698_v50 }
0x2b79   : > { %v1176_v35 = vpop.permute.xlu0 %1175 }
0x2b7a   : > { %1179 = vst.msk [vmem:[%s2708_s13 + $0x4] sm:$0x8] %vm1178_vm9, %v1176_v35 }
0x2b7d   : > { %v1330_v11 = vpop.permute.xlu0 %1329 }
0x2b7e   : > { %1333 = vst.msk [vmem:[%s2708_s13 + $0x4] sm:$0x2] %vm1332_vm10, %v1330_v11 }
0x2b81   : > { %v1483_v51 = vpop.permute.xlu0 %1482 }
0x2b82   : > { %1485 = vst.msk [vmem:[%s2708_s13] sm:$0x8] %vm1178_vm9, %v1483_v51 }
0x2b85   : > { %v2311_v52 = vpop.eup %2310  ;;  %v1635_v53 = vpop.permute.xlu0 %1634 }
0x2b86   : > { %1637 = vst.msk [vmem:[%s2708_s13] sm:$0x2] %vm1332_vm10, %v1635_v53  ;;  %1701 = vrot.lane.b32.xlu1 %v2311_v52, %s2494_s14 }
0x2b8a   : > { %1252 = vrot.lane.b32.xlu1 %v1251_v54, %s2495_s26 }
0x2b8e   : > { %1405 = vrot.lane.b32.xlu1 %v2926_v31, %s2495_s26 }
0x2b92   : > { %1558 = vrot.lane.b32.xlu1 %v1557_v55, %s2495_s26 }
0x2bf8   : > { %v1702_v57 = vpop.permute.xlu1 %1701 }
0x2bf9   : > { %v1704_v59 = vmul.f32 %v1702_v57, %v1687_v41 }
0x2bfb   : > { %v1963_v61 = vpack.c.bf16 %v1704_v59, %v1704_v59  ;;  %1714 = vrot.lane.b32.xlu0 %v1704_v59, %s2495_s26 }
0x2bfc   : > { %v1253_v39 = vpop.permute.xlu1 %1252 }
0x2bfd   : > { %1256 = vst.msk [vmem:[%s2708_s13 + $0x4] sm:$0x4] %vm1255_vm11, %v1253_v39  ;;  %1709 = vrot.lane.b32.xlu1 %v1963_v61, %s2495_s26 }
0x2c00   : > { %v1406_v56 = vpop.permute.xlu1 %1405 }
0x2c01   : > { %1409 = vst.msk [vmem:[%s2708_s13 + $0x4] sm:$0x1] %vm1408_vm12, %v1406_v56  ;;  %1720 = vrot.lane.b32.xlu1 %v1698_v50, %s2496_s9 }
0x2c04   : > { %v1559_v31 = vpop.permute.xlu1 %1558 }
0x2c05   : > { %1561 = vst.msk [vmem:[%s2708_s13] sm:$0x4] %vm1255_vm11, %v1559_v31 }
0x2c6d   : > { %v1715_v20 = vpop.permute.xlu0 %1714 }
0x2c6e   : > { %1718 = vst.msk [vmem:[#allocation2] sm:$0x3] %vm356_vm0, %v1715_v20 }
0x2c6f   : > { %v1710_v62 = vpop.permute.xlu1 %1709 }
0x2c70   : > { %1712 = vst.msk [vmem:[%s2708_s13] sm:$0x1] %vm1408_vm12, %v1710_v62 }
0x2c73   : > { %v1721_v63 = vpop.permute.xlu1 %1720 }
0x2c74   : > { %1723 = vst.msk [vmem:[#allocation3] sm:$0x3] %vm356_vm0, %v1721_v63 }
0x2c75 PF: > { %s1964_s6 = sshll.u32 %s2470_s18, 7  ;;  %s1744_s21 = sshll.u32 %s2708_s13, 4  ;;  %s2997_s21 = int_to_ptr.vmem [resolvable:$true] %s1744_s21 }
0x2c76   : > { %s2994_s7 = scalar_lea.hbm %s3049_s4, %s1964_s6  ;;  %s1725_s27 = scalar_lea.sflag [#allocation7], %s2682_s10 }
0x2c77   : > { %s2394_s5 = scalar_lea.vmem %s2997_s21, 128  ;;  %p3063_p2 = scmp.ne.s32.totalorder %s3055_s28, 0 }
0x2c78   : > { %p2395_p4 = scmp.ne.s32.totalorder %s2997_s21, %s2394_s5  ;;  %s2497_s1 = smov [#allocation11]  }
0x2c79   : > { %s2398_s24 = sshll.u32 %s2497_s1, 4  ;;  %s2399_s24 = int_to_ptr.vmem [resolvable:$false] %s2398_s24 }
0x2c7a   : > { %p2396_p13 = pnand %p2395_p4, %p3063_p2  ;;  %s2400_s18 = scalar_lea.vmem %s2399_s24, 256 }
0x2c7b   : > { %p2401_p11 = scmp.lt.s32.totalorder %s2997_s21, %s2399_s24  ;;  %p2402_p9 = scmp.lt.s32.totalorder %s2400_s18, %s2394_s5 }
0x2c7c   : > { %p2397_p1 = pneg %p2396_p13 }
0x2c7d   : > { %p2403_p6 = por %p2402_p9, %p2401_p11 }
0x2c7f   : > { %p2404_p7 = pnand %p2403_p6, %p2397_p1 }
0x2c81   : > { %2407 = shalt.err (!%p2404_p7)
}
0x2c82   : > { %s2408_s13 = scalar_lea.hbm %s2994_s7, 128  ;;  %s2412_s8 = scalar_lea.hbm %s3049_s4, 256 }
0x2c83   : > { %p2409_p10 = scmp.ne.s32.totalorder %s2994_s7, %s2408_s13  ;;  %p2413_p8 = scmp.lt.s32.totalorder %s2994_s7, %s3049_s4 }
0x2c84   : > { %p2414_p12 = scmp.lt.s32.totalorder %s2412_s8, %s2408_s13 }
0x2c85   : > { %p2410_p0 = pnand %p2409_p10, %p3063_p2 }
0x2c86   : > { %p2415_p5 = por %p2414_p12, %p2413_p8 }
0x2c87   : > { %p2411_p3 = pneg %p2410_p0 }
0x2c89   : > { %p2416_p4 = pnand %p2415_p5, %p2411_p3 }
0x2c8b   : > { %2419 = shalt.err (!%p2416_p4)
}
0x2c8c   : > { %s2498_s9 = smov 64   ;;  %s2499_s6 = smov 4  }
0x2c8d   : > { %2160 = dma.vmem_to_hbm [thread:$0]  (%p3063_p2), %s2997_s21, 128, %s2994_s7, %s1725_s27, %s2498_s9, %s2498_s9, %s2499_s6  }
0x2c8e PF: > { %s1759_s12 = sand.u32 1, %s2458_s15   ;;  %p3064_p13 = scmp.ne.s32.totalorder %s3056_s30, 0 }
0x2c8f   : > { %p3065_p1 = scmp.ge.s32.totalorder %s2478_s20, 2  ;;  %s1760_s11 = scalar_lea.sflag [#allocation7], %s1759_s12 }
0x2c91   : > { %p2173_p11 = pnand %p3065_p1, %p3064_p13 }
0x2c93   : > { %p2174_p9 = pneg %p2173_p11 }
0x2c95   : > { %2453 = dma.done.wait (%p2174_p9), %s1760_s11, 128  }
0x2c96   : > { %2455 = vsyncadd (%p2174_p9), %s1760_s11, 4294967168  ;;  %s23_s20 = sadd.s32 1, %s2478_s20   ;;  %s3066_s15 = smov %s2462_s16 }
0x2c97   : > { %p20_p6 = scmp.ge.s32.totalorder %s23_s20, 4   ;;  %s3067_s16 = smov %s2466_s17 }
0x2c98   : > { %s3068_s17 = smov %s2589_s29  ;;  %s3069_s18 = smov %s2474_s19 }
0x2c99   : > { %s3070_s19 = smov %s3072_s23  ;;  %22 = sbr.rel (!%p20_p6) target bundleno = 10 (0xa), region = 120 }
0x2c9e   :  { %1765 = vsyncpa [#allocation6], 1 }
0x2c9f   :  { %1767 = vsyncpa [#allocation6 + $0x1], 1 }
0x2ca0   :  { %1768 = vsyncpa [#allocation9], 1 }
0x2ca1   :  { %1770 = vsyncpa [#allocation9 + $0x1], 1 }
0x2ca2   :  { %1771 = vsyncpa [#allocation7], 1 }
0x2ca3   :  { %1773 = vsyncpa [#allocation7 + $0x1], 1 }

</bundles_post_ra>
